<compile_context>
chip_gen: v5e
topology: v5e:2x2
jax: 0.10.0
libtpu: 0.0.40
codegen_flags: <defaults>
</compile_context>

<pallas_src>
import functools

import jax
import jax.numpy as jnp
from jax.experimental import pallas as pl
from jax.experimental.pallas import tpu as pltpu

NEG_SLOPE = 0.01   # nn.LeakyReLU default
EPS = 1e-5         # nn.GroupNorm default


def _round_up(v, m):
    return ((v + m - 1) // m) * m


def double_conv_kernel(x_ref, w1_ref, w2_ref, g_ref, b_ref, cm_ref, *rest,
                       H, W, Cin_p, Cmid_p, Cout, Cmid_true, bB, pad_l, residual):
    """One grid step = bB batch elements, concatenated along the pixel (N) axis.

    x_ref  : (bB, Cin_p, HW)       channels-first, flattened pixels (lane-dense)
    w1_ref : (Cmid_p, 9*Cin_p)     conv1 weight, taps flattened into the K dim
    w2_ref : (Cout_p, 9*Cmid_p)    conv2 weight
    g_ref, b_ref : (Cmid_p, 1)     GroupNorm affine (f32, zero-padded channels)
    cm_ref : (2, HW)               multiplicative column masks for kx = -1 / +1
    rest   : [wres_ref (Cout_p, Cin_p)], out_ref (bB, Cout, HW),
             xpad (Cin_p, PW), ypad (Cmid_p, PW),
             slab1 (9*Cin_p, bB*HW), slab2 (9*Cmid_p, bB*HW)
    """
    if residual:
        wres_ref, out_ref, xpad, ypad, slab1, slab2 = rest
    else:
        out_ref, xpad, ypad, slab1, slab2 = rest

    HW = H * W
    cm_l = cm_ref[0:1, :]        # valid where col >= 1      (tap kx = -1)
    cm_r = cm_ref[1:2, :]        # valid where col <= W - 2  (tap kx = +1)

    # Zero the halo buffers once per step; only their interiors are rewritten per sample,
    # so the left/right zero pads implement the conv's zero row padding for free.
    xpad[...] = jnp.zeros_like(xpad)
    ypad[...] = jnp.zeros_like(ypad)

    def write_taps(src_pad, slab, C, b):
        # The 9 taps are plain offset slices of the zero-padded row buffer (no rolls,
        # no row masks); only the two column-wrap masks are applied.
        for t, (ry, rx) in enumerate((ry, rx) for ry in (-1, 0, 1) for rx in (-1, 0, 1)):
            tap = src_pad[:, pl.ds(pad_l + ry * W + rx, HW)]
            if rx == -1:
                tap = tap * cm_l
            elif rx == 1:
                tap = tap * cm_r
            slab[pl.ds(t * C, C), pl.ds(b * HW, HW)] = tap   # aligned slab write

    # ---- conv1: build batch-wide im2col slab, then one MXU matmul (K = 9*Cin_p) ----
    for b in range(bB):
        xpad[:, pl.ds(pad_l, HW)] = x_ref[b]                 # aligned interior store
        write_taps(xpad, slab1, Cin_p, b)
    y1 = jnp.dot(w1_ref[...], slab1[...],
                 preferred_element_type=jnp.float32)          # (Cmid_p, bB*HW) f32

    # ---- GroupNorm(num_groups=1) per sample (fused sum/sumsq) + affine + LeakyReLU ----
    gam = g_ref[...]                                          # (Cmid_p, 1) f32
    bet = b_ref[...]
    inv_n = 1.0 / float(Cmid_true * HW)                       # padded channels are exactly 0
    for b in range(bB):
        seg = y1[:, b * HW:(b + 1) * HW]                      # (Cmid_p, HW) f32
        s = jnp.sum(seg, keepdims=True)                       # (1, 1)
        ss = jnp.sum(seg * seg, keepdims=True)
        mean = s * inv_n
        var = ss * inv_n - mean * mean                        # biased var (matches PyTorch GN)
        a = gam * jax.lax.rsqrt(var + EPS)                    # (Cmid_p, 1)
        c = bet - mean * a
        z = seg * a + c                                       # single normalize+affine pass
        z = jnp.maximum(z, NEG_SLOPE * z)                     # LeakyReLU as mul+max
        ypad[:, pl.ds(pad_l, HW)] = z.astype(ypad.dtype)
        write_taps(ypad, slab2, Cmid_p, b)

    # ---- conv2 (one matmul) + LeakyReLU, optional 1x1 residual on the original input ----
    y2 = jnp.dot(w2_ref[...], slab2[...],
                 preferred_element_type=jnp.float32)          # (Cout_p, bB*HW) f32
    y2 = jnp.maximum(y2, NEG_SLOPE * y2)
    if residual:
        # center tap rows of slab1 are exactly the (batch-concatenated) input
        x_cat = slab1[pl.ds(4 * Cin_p, Cin_p), :]
        y2 = y2 + jnp.dot(wres_ref[...], x_cat, preferred_element_type=jnp.float32)

    # lane-dense (Cout, HW) stores; padded output channels are dropped here
    for b in range(bB):
        out_ref[b] = y2[:Cout, b * HW:(b + 1) * HW].astype(out_ref.dtype)


def double_conv(x_nchw, w1, gamma, beta, w2, w_res=None):
    """Pallas implementation of DoubleConv.forward.

    x_nchw : (B, Cin, H, W)
    w1     : (Cmid, Cin, 3, 3)   first conv weight (PyTorch OIHW)
    gamma, beta : (Cmid,)        GroupNorm affine
    w2     : (Cout, Cmid, 3, 3)  second conv weight
    w_res  : (Cout, Cin, 1, 1) or None
    returns: (B, Cout, H, W)
    """
    B, Cin, H, W = x_nchw.shape
    Cmid = w1.shape[0]
    Cout = w2.shape[0]
    HW = H * W
    residual = w_res is not None

    # bf16 operands stay bf16 on the MXU/tap path; everything else computes in f32.
    cdtype = jnp.bfloat16 if x_nchw.dtype == jnp.bfloat16 else jnp.float32
    esz = jnp.dtype(cdtype).itemsize

    # Pad channel counts to full sublane tiles so the single fat-K im2col matmul always applies.
    cmul = 16 if cdtype == jnp.bfloat16 else 8
    Cin_p, Cmid_p, Cout_p = (_round_up(c, cmul) for c in (Cin, Cmid, Cout))

    # channels-first flat layout: free contiguous reshape of NCHW (no transpose)
    x_flat = x_nchw.astype(cdtype).reshape(B, Cin, HW)
    if Cin_p != Cin:
        x_flat = jnp.pad(x_flat, ((0, 0), (0, Cin_p - Cin), (0, 0)))

    def prep_w3x3(w, o_p, i_p):
        o, i = w.shape[0], w.shape[1]
        w = jnp.transpose(w.astype(cdtype), (0, 2, 3, 1))      # OIHW -> (O, ky, kx, I)
        w = jnp.pad(w, ((0, o_p - o), (0, 0), (0, 0), (0, i_p - i)))
        return w.reshape(o_p, 9 * i_p)                          # col t*i_p + ci -> tap t, chan ci

    w1_flat = prep_w3x3(w1, Cmid_p, Cin_p)
    w2_flat = prep_w3x3(w2, Cout_p, Cmid_p)
    g = jnp.pad(gamma.astype(jnp.float32).reshape(Cmid, 1), ((0, Cmid_p - Cmid), (0, 0)))
    bt = jnp.pad(beta.astype(jnp.float32).reshape(Cmid, 1), ((0, Cmid_p - Cmid), (0, 0)))

    # multiplicative column-boundary masks (row boundaries handled by the zero halo)
    col = jnp.arange(HW, dtype=jnp.int32) % W
    cmask = jnp.stack([col >= 1, col <= W - 2]).astype(cdtype)  # (2, HW)

    # zero-padded pixel-row buffer: lane-aligned left pad, both pads >= W + 1
    pad_l = _round_up(W + 1, 128)
    pad_r = W + 1
    PW = pad_l + HW + pad_r

    # batch block: largest divisor of B (<= 8) whose per-step working set stays modest
    def step_bytes(bb):
        slabs = (9 * Cin_p + 9 * Cmid_p) * bb * HW * esz
        pads = (Cin_p + Cmid_p) * PW * esz
        vals = (Cmid_p + Cout_p) * bb * HW * 4                  # f32 matmul results
        blocks = 2 * bb * (Cin_p * HW * esz + Cout * HW * x_nchw.dtype.itemsize)
        weights = (w1_flat.size + w2_flat.size) * esz
        return slabs + pads + vals + blocks + weights

    bB = 1
    for d in range(1, min(B, 8) + 1):
        if B % d == 0 and step_bytes(d) <= 24 * 1024 * 1024:
            bB = d

    args = [x_flat, w1_flat, w2_flat, g, bt, cmask]
    in_specs = [
        pl.BlockSpec((bB, Cin_p, HW), lambda i: (i, 0, 0)),
        pl.BlockSpec((Cmid_p, 9 * Cin_p), lambda i: (0, 0)),
        pl.BlockSpec((Cout_p, 9 * Cmid_p), lambda i: (0, 0)),
        pl.BlockSpec((Cmid_p, 1), lambda i: (0, 0)),
        pl.BlockSpec((Cmid_p, 1), lambda i: (0, 0)),
        pl.BlockSpec((2, HW), lambda i: (0, 0)),
    ]
    if residual:
        wr = jnp.pad(w_res.astype(cdtype).reshape(Cout, Cin),
                     ((0, Cout_p - Cout), (0, Cin_p - Cin)))
        args.append(wr)
        in_specs.append(pl.BlockSpec((Cout_p, Cin_p), lambda i: (0, 0)))

    scratch_shapes = [
        pltpu.VMEM((Cin_p, PW), cdtype),             # zero-padded input rows (conv1 halo)
        pltpu.VMEM((Cmid_p, PW), cdtype),            # zero-padded GN/LeakyReLU rows (conv2 halo)
        pltpu.VMEM((9 * Cin_p, bB * HW), cdtype),    # conv1 im2col slab
        pltpu.VMEM((9 * Cmid_p, bB * HW), cdtype),   # conv2 im2col slab
    ]

    # size the scoped-VMEM request from the working set, clamped to the chip's VMEM
    try:
        phys_vmem = int(pltpu.get_tpu_info().vmem_capacity_bytes)
    except Exception:
        phys_vmem = 64 * 1024 * 1024                 # conservative (v7x per-core) default
    vmem_limit = int(min(max(32 * 1024 * 1024, 2 * step_bytes(bB)),
                         int(phys_vmem * 0.75)))

    kernel = functools.partial(
        double_conv_kernel, H=H, W=W, Cin_p=Cin_p, Cmid_p=Cmid_p, Cout=Cout,
        Cmid_true=Cmid, bB=bB, pad_l=pad_l, residual=residual)

    # TODO(synk): for large images / channel counts (esp. v7x's 64 MiB VMEM), add an
    # H-slab grid axis with a 1-row halo plus a two-pass (scratch sum/sumsq) GroupNorm,
    # and pad H*W up to a multiple of 128 for odd spatial sizes.
    out_flat = pl.pallas_call(
        kernel,
        out_shape=jax.ShapeDtypeStruct((B, Cout, HW), x_nchw.dtype),
        grid_spec=pltpu.PrefetchScalarGridSpec(
            num_scalar_prefetch=0,
            grid=(B // bB,),
            in_specs=in_specs,
            out_specs=pl.BlockSpec((bB, Cout, HW), lambda i: (i, 0, 0)),
            scratch_shapes=scratch_shapes,
        ),
        compiler_params=pltpu.CompilerParams(
            dimension_semantics=("parallel",),
            vmem_limit_bytes=vmem_limit,
        ),
    )(*args)

    return out_flat.reshape(B, Cout, H, W)


def ref_double_conv(x, w1, gamma, beta, w2, w_res=None):
    """Pure-JAX reference matching the PyTorch forward exactly."""
    def conv(inp, w, pad):
        return jax.lax.conv_general_dilated(
            inp, w, window_strides=(1, 1), padding=[(pad, pad), (pad, pad)],
            dimension_numbers=("NCHW", "OIHW", "NCHW"))

    y = conv(x, w1, 1)
    mean = jnp.mean(y, axis=(1, 2, 3), keepdims=True)
    var = jnp.var(y, axis=(1, 2, 3), keepdims=True)
    y = (y - mean) / jnp.sqrt(var + EPS)
    y = y * gamma.reshape(1, -1, 1, 1) + beta.reshape(1, -1, 1, 1)
    y = jnp.where(y > 0, y, NEG_SLOPE * y)
    y = conv(y, w2, 1)
    y = jnp.where(y > 0, y, NEG_SLOPE * y)
    if w_res is not None:
        y = y + conv(x, w_res, 0)
    return y


if __name__ == "__main__":
    # Small shapes consistent with the module: (b, in_channels, h, w)
    B, Cin, H, W = 2, 4, 16, 16
    Cmid, Cout = 8, 8  # mid_channels defaults to out_channels

    key = jax.random.PRNGKey(0)
    kx, k1, k2, kg, kb, kr = jax.random.split(key, 6)

    x = jax.random.normal(kx, (B, Cin, H, W), jnp.float32)
    w1 = jax.random.normal(k1, (Cmid, Cin, 3, 3), jnp.float32) * 0.2
    w2 = jax.random.normal(k2, (Cout, Cmid, 3, 3), jnp.float32) * 0.2
    gamma = 1.0 + 0.1 * jax.random.normal(kg, (Cmid,), jnp.float32)
    beta = 0.1 * jax.random.normal(kb, (Cmid,), jnp.float32)
    w_res = jax.random.normal(kr, (Cout, Cin, 1, 1), jnp.float32) * 0.2

    # residual=False path
    out = jax.block_until_ready(double_conv(x, w1, gamma, beta, w2, None))
    ref = ref_double_conv(x, w1, gamma, beta, w2, None)
    assert out.shape == (B, Cout, H, W)
    assert jnp.allclose(out, ref, rtol=1e-3, atol=1e-4), "residual=False mismatch"

    # residual=True path
    out_r = jax.block_until_ready(double_conv(x, w1, gamma, beta, w2, w_res))
    ref_r = ref_double_conv(x, w1, gamma, beta, w2, w_res)
    assert jnp.allclose(out_r, ref_r, rtol=1e-3, atol=1e-4), "residual=True mismatch"

    print("KERNEL_OK")
</pallas_src>

<mosaic_0001>
module attributes {stable_mosaic.version = 11 : i64} {
  func.func @double_conv_kernel(%arg0: i32, %arg1: memref<2x8x256xf32, #tpu.memory_space<vmem>>, %arg2: memref<8x72xf32, #tpu.memory_space<vmem>>, %arg3: memref<8x72xf32, #tpu.memory_space<vmem>>, %arg4: memref<8x1xf32, #tpu.memory_space<vmem>>, %arg5: memref<8x1xf32, #tpu.memory_space<vmem>>, %arg6: memref<2x256xf32, #tpu.memory_space<vmem>>, %arg7: memref<2x8x256xf32, #tpu.memory_space<vmem>>, %arg8: memref<8x401xf32, #tpu.memory_space<vmem>>, %arg9: memref<8x401xf32, #tpu.memory_space<vmem>>, %arg10: memref<72x512xf32, #tpu.memory_space<vmem>>, %arg11: memref<72x512xf32, #tpu.memory_space<vmem>>) attributes {dimension_semantics = [#tpu.dimension_semantics<parallel>], iteration_bounds = array<i64: 1>, scalar_prefetch = 0 : i64, scratch_operands = 4 : i64, tpu.core_type = #tpu.core_type<tc>, window_params = [{transform_indices = @transform_0, window_bounds = array<i64: 2, 8, 256>}, {pipeline_mode = #tpu.pipeline_mode<synchronous>, transform_indices = @transform_1, window_bounds = array<i64: 8, 72>}, {pipeline_mode = #tpu.pipeline_mode<synchronous>, transform_indices = @transform_2, window_bounds = array<i64: 8, 72>}, {pipeline_mode = #tpu.pipeline_mode<synchronous>, transform_indices = @transform_3, window_bounds = array<i64: 8, 1>}, {pipeline_mode = #tpu.pipeline_mode<synchronous>, transform_indices = @transform_4, window_bounds = array<i64: 8, 1>}, {pipeline_mode = #tpu.pipeline_mode<synchronous>, transform_indices = @transform_5, window_bounds = array<i64: 2, 256>}, {transform_indices = @transform_6, window_bounds = array<i64: 2, 8, 256>}]} {
    %c0 = arith.constant 0 : index
    %c0_0 = arith.constant 0 : index
    %0 = vector.load %arg6[%c0, %c0_0] : memref<2x256xf32, #tpu.memory_space<vmem>>, vector<1x256xf32>
    %c1 = arith.constant 1 : index
    %c0_1 = arith.constant 0 : index
    %1 = vector.load %arg6[%c1, %c0_1] : memref<2x256xf32, #tpu.memory_space<vmem>>, vector<1x256xf32>
    %cst = arith.constant 0.000000e+00 : f32
    %2 = vector.broadcast %cst : f32 to vector<8x401xf32>
    %c0_2 = arith.constant 0 : index
    %c0_3 = arith.constant 0 : index
    %3 = vector.load %arg8[%c0_2, %c0_3] : memref<8x401xf32, #tpu.memory_space<vmem>>, vector<8x401xf32>
    tpu.vector_store %arg8[%c0_2, %c0_3], %2 {strides = array<i32>} : memref<8x401xf32, #tpu.memory_space<vmem>>, vector<8x401xf32>,
    %cst_4 = arith.constant 0.000000e+00 : f32
    %4 = vector.broadcast %cst_4 : f32 to vector<8x401xf32>
    %c0_5 = arith.constant 0 : index
    %c0_6 = arith.constant 0 : index
    %5 = vector.load %arg9[%c0_5, %c0_6] : memref<8x401xf32, #tpu.memory_space<vmem>>, vector<8x401xf32>
    tpu.vector_store %arg9[%c0_5, %c0_6], %4 {strides = array<i32>} : memref<8x401xf32, #tpu.memory_space<vmem>>, vector<8x401xf32>,
    %c0_7 = arith.constant 0 : index
    %c0_8 = arith.constant 0 : index
    %c0_9 = arith.constant 0 : index
    %6 = vector.load %arg1[%c0_7, %c0_8, %c0_9] : memref<2x8x256xf32, #tpu.memory_space<vmem>>, vector<1x8x256xf32>
    %7 = vector.shape_cast %6 : vector<1x8x256xf32> to vector<8x256xf32>
    %c0_10 = arith.constant 0 : index
    %c128 = arith.constant 128 : index
    %8 = vector.load %arg8[%c0_10, %c128] : memref<8x401xf32, #tpu.memory_space<vmem>>, vector<8x256xf32>
    tpu.vector_store %arg8[%c0_10, %c128], %7 {strides = array<i32>} : memref<8x401xf32, #tpu.memory_space<vmem>>, vector<8x256xf32>,
    %c0_11 = arith.constant 0 : index
    %c111 = arith.constant 111 : index
    %9 = vector.load %arg8[%c0_11, %c111] : memref<8x401xf32, #tpu.memory_space<vmem>>, vector<8x256xf32>
    %10 = vector.broadcast %0 : vector<1x256xf32> to vector<8x256xf32>
    %11 = arith.mulf %9, %10 : vector<8x256xf32>
    %c0_12 = arith.constant 0 : index
    %c0_13 = arith.constant 0 : index
    %12 = vector.load %arg10[%c0_12, %c0_13] : memref<72x512xf32, #tpu.memory_space<vmem>>, vector<8x256xf32>
    tpu.vector_store %arg10[%c0_12, %c0_13], %11 {strides = array<i32>} : memref<72x512xf32, #tpu.memory_space<vmem>>, vector<8x256xf32>,
    %c0_14 = arith.constant 0 : index
    %c112 = arith.constant 112 : index
    %13 = vector.load %arg8[%c0_14, %c112] : memref<8x401xf32, #tpu.memory_space<vmem>>, vector<8x256xf32>
    %c8 = arith.constant 8 : index
    %c0_15 = arith.constant 0 : index
    %14 = vector.load %arg10[%c8, %c0_15] : memref<72x512xf32, #tpu.memory_space<vmem>>, vector<8x256xf32>
    tpu.vector_store %arg10[%c8, %c0_15], %13 {strides = array<i32>} : memref<72x512xf32, #tpu.memory_space<vmem>>, vector<8x256xf32>,
    %c0_16 = arith.constant 0 : index
    %c113 = arith.constant 113 : index
    %15 = vector.load %arg8[%c0_16, %c113] : memref<8x401xf32, #tpu.memory_space<vmem>>, vector<8x256xf32>
    %16 = vector.broadcast %1 : vector<1x256xf32> to vector<8x256xf32>
    %17 = arith.mulf %15, %16 : vector<8x256xf32>
    %c16 = arith.constant 16 : index
    %c0_17 = arith.constant 0 : index
    %18 = vector.load %arg10[%c16, %c0_17] : memref<72x512xf32, #tpu.memory_space<vmem>>, vector<8x256xf32>
    tpu.vector_store %arg10[%c16, %c0_17], %17 {strides = array<i32>} : memref<72x512xf32, #tpu.memory_space<vmem>>, vector<8x256xf32>,
    %c0_18 = arith.constant 0 : index
    %c127 = arith.constant 127 : index
    %19 = vector.load %arg8[%c0_18, %c127] : memref<8x401xf32, #tpu.memory_space<vmem>>, vector<8x256xf32>
    %20 = vector.broadcast %0 : vector<1x256xf32> to vector<8x256xf32>
    %21 = arith.mulf %19, %20 : vector<8x256xf32>
    %c24 = arith.constant 24 : index
    %c0_19 = arith.constant 0 : index
    %22 = vector.load %arg10[%c24, %c0_19] : memref<72x512xf32, #tpu.memory_space<vmem>>, vector<8x256xf32>
    tpu.vector_store %arg10[%c24, %c0_19], %21 {strides = array<i32>} : memref<72x512xf32, #tpu.memory_space<vmem>>, vector<8x256xf32>,
    %c0_20 = arith.constant 0 : index
    %c128_21 = arith.constant 128 : index
    %23 = vector.load %arg8[%c0_20, %c128_21] : memref<8x401xf32, #tpu.memory_space<vmem>>, vector<8x256xf32>
    %c32 = arith.constant 32 : index
    %c0_22 = arith.constant 0 : index
    %24 = vector.load %arg10[%c32, %c0_22] : memref<72x512xf32, #tpu.memory_space<vmem>>, vector<8x256xf32>
    tpu.vector_store %arg10[%c32, %c0_22], %23 {strides = array<i32>} : memref<72x512xf32, #tpu.memory_space<vmem>>, vector<8x256xf32>,
    %c0_23 = arith.constant 0 : index
    %c129 = arith.constant 129 : index
    %25 = vector.load %arg8[%c0_23, %c129] : memref<8x401xf32, #tpu.memory_space<vmem>>, vector<8x256xf32>
    %26 = vector.broadcast %1 : vector<1x256xf32> to vector<8x256xf32>
    %27 = arith.mulf %25, %26 : vector<8x256xf32>
    %c40 = arith.constant 40 : index
    %c0_24 = arith.constant 0 : index
    %28 = vector.load %arg10[%c40, %c0_24] : memref<72x512xf32, #tpu.memory_space<vmem>>, vector<8x256xf32>
    tpu.vector_store %arg10[%c40, %c0_24], %27 {strides = array<i32>} : memref<72x512xf32, #tpu.memory_space<vmem>>, vector<8x256xf32>,
    %c0_25 = arith.constant 0 : index
    %c143 = arith.constant 143 : index
    %29 = vector.load %arg8[%c0_25, %c143] : memref<8x401xf32, #tpu.memory_space<vmem>>, vector<8x256xf32>
    %30 = vector.broadcast %0 : vector<1x256xf32> to vector<8x256xf32>
    %31 = arith.mulf %29, %30 : vector<8x256xf32>
    %c48 = arith.constant 48 : index
    %c0_26 = arith.constant 0 : index
    %32 = vector.load %arg10[%c48, %c0_26] : memref<72x512xf32, #tpu.memory_space<vmem>>, vector<8x256xf32>
    tpu.vector_store %arg10[%c48, %c0_26], %31 {strides = array<i32>} : memref<72x512xf32, #tpu.memory_space<vmem>>, vector<8x256xf32>,
    %c0_27 = arith.constant 0 : index
    %c144 = arith.constant 144 : index
    %33 = vector.load %arg8[%c0_27, %c144] : memref<8x401xf32, #tpu.memory_space<vmem>>, vector<8x256xf32>
    %c56 = arith.constant 56 : index
    %c0_28 = arith.constant 0 : index
    %34 = vector.load %arg10[%c56, %c0_28] : memref<72x512xf32, #tpu.memory_space<vmem>>, vector<8x256xf32>
    tpu.vector_store %arg10[%c56, %c0_28], %33 {strides = array<i32>} : memref<72x512xf32, #tpu.memory_space<vmem>>, vector<8x256xf32>,
    %c0_29 = arith.constant 0 : index
    %c145 = arith.constant 145 : index
    %35 = vector.load %arg8[%c0_29, %c145] : memref<8x401xf32, #tpu.memory_space<vmem>>, vector<8x256xf32>
    %36 = vector.broadcast %1 : vector<1x256xf32> to vector<8x256xf32>
    %37 = arith.mulf %35, %36 : vector<8x256xf32>
    %c64 = arith.constant 64 : index
    %c0_30 = arith.constant 0 : index
    %38 = vector.load %arg10[%c64, %c0_30] : memref<72x512xf32, #tpu.memory_space<vmem>>, vector<8x256xf32>
    tpu.vector_store %arg10[%c64, %c0_30], %37 {strides = array<i32>} : memref<72x512xf32, #tpu.memory_space<vmem>>, vector<8x256xf32>,
    %c1_31 = arith.constant 1 : index
    %c0_32 = arith.constant 0 : index
    %c0_33 = arith.constant 0 : index
    %39 = vector.load %arg1[%c1_31, %c0_32, %c0_33] : memref<2x8x256xf32, #tpu.memory_space<vmem>>, vector<1x8x256xf32>
    %40 = vector.shape_cast %39 : vector<1x8x256xf32> to vector<8x256xf32>
    %c0_34 = arith.constant 0 : index
    %c128_35 = arith.constant 128 : index
    %41 = vector.load %arg8[%c0_34, %c128_35] : memref<8x401xf32, #tpu.memory_space<vmem>>, vector<8x256xf32>
    tpu.vector_store %arg8[%c0_34, %c128_35], %40 {strides = array<i32>} : memref<8x401xf32, #tpu.memory_space<vmem>>, vector<8x256xf32>,
    %c0_36 = arith.constant 0 : index
    %c111_37 = arith.constant 111 : index
    %42 = vector.load %arg8[%c0_36, %c111_37] : memref<8x401xf32, #tpu.memory_space<vmem>>, vector<8x256xf32>
    %43 = vector.broadcast %0 : vector<1x256xf32> to vector<8x256xf32>
    %44 = arith.mulf %42, %43 : vector<8x256xf32>
    %c0_38 = arith.constant 0 : index
    %c256 = arith.constant 256 : index
    %45 = vector.load %arg10[%c0_38, %c256] : memref<72x512xf32, #tpu.memory_space<vmem>>, vector<8x256xf32>
    tpu.vector_store %arg10[%c0_38, %c256], %44 {strides = array<i32>} : memref<72x512xf32, #tpu.memory_space<vmem>>, vector<8x256xf32>,
    %c0_39 = arith.constant 0 : index
    %c112_40 = arith.constant 112 : index
    %46 = vector.load %arg8[%c0_39, %c112_40] : memref<8x401xf32, #tpu.memory_space<vmem>>, vector<8x256xf32>
    %c8_41 = arith.constant 8 : index
    %c256_42 = arith.constant 256 : index
    %47 = vector.load %arg10[%c8_41, %c256_42] : memref<72x512xf32, #tpu.memory_space<vmem>>, vector<8x256xf32>
    tpu.vector_store %arg10[%c8_41, %c256_42], %46 {strides = array<i32>} : memref<72x512xf32, #tpu.memory_space<vmem>>, vector<8x256xf32>,
    %c0_43 = arith.constant 0 : index
    %c113_44 = arith.constant 113 : index
    %48 = vector.load %arg8[%c0_43, %c113_44] : memref<8x401xf32, #tpu.memory_space<vmem>>, vector<8x256xf32>
    %49 = vector.broadcast %1 : vector<1x256xf32> to vector<8x256xf32>
    %50 = arith.mulf %48, %49 : vector<8x256xf32>
    %c16_45 = arith.constant 16 : index
    %c256_46 = arith.constant 256 : index
    %51 = vector.load %arg10[%c16_45, %c256_46] : memref<72x512xf32, #tpu.memory_space<vmem>>, vector<8x256xf32>
    tpu.vector_store %arg10[%c16_45, %c256_46], %50 {strides = array<i32>} : memref<72x512xf32, #tpu.memory_space<vmem>>, vector<8x256xf32>,
    %c0_47 = arith.constant 0 : index
    %c127_48 = arith.constant 127 : index
    %52 = vector.load %arg8[%c0_47, %c127_48] : memref<8x401xf32, #tpu.memory_space<vmem>>, vector<8x256xf32>
    %53 = vector.broadcast %0 : vector<1x256xf32> to vector<8x256xf32>
    %54 = arith.mulf %52, %53 : vector<8x256xf32>
    %c24_49 = arith.constant 24 : index
    %c256_50 = arith.constant 256 : index
    %55 = vector.load %arg10[%c24_49, %c256_50] : memref<72x512xf32, #tpu.memory_space<vmem>>, vector<8x256xf32>
    tpu.vector_store %arg10[%c24_49, %c256_50], %54 {strides = array<i32>} : memref<72x512xf32, #tpu.memory_space<vmem>>, vector<8x256xf32>,
    %c0_51 = arith.constant 0 : index
    %c128_52 = arith.constant 128 : index
    %56 = vector.load %arg8[%c0_51, %c128_52] : memref<8x401xf32, #tpu.memory_space<vmem>>, vector<8x256xf32>
    %c32_53 = arith.constant 32 : index
    %c256_54 = arith.constant 256 : index
    %57 = vector.load %arg10[%c32_53, %c256_54] : memref<72x512xf32, #tpu.memory_space<vmem>>, vector<8x256xf32>
    tpu.vector_store %arg10[%c32_53, %c256_54], %56 {strides = array<i32>} : memref<72x512xf32, #tpu.memory_space<vmem>>, vector<8x256xf32>,
    %c0_55 = arith.constant 0 : index
    %c129_56 = arith.constant 129 : index
    %58 = vector.load %arg8[%c0_55, %c129_56] : memref<8x401xf32, #tpu.memory_space<vmem>>, vector<8x256xf32>
    %59 = vector.broadcast %1 : vector<1x256xf32> to vector<8x256xf32>
    %60 = arith.mulf %58, %59 : vector<8x256xf32>
    %c40_57 = arith.constant 40 : index
    %c256_58 = arith.constant 256 : index
    %61 = vector.load %arg10[%c40_57, %c256_58] : memref<72x512xf32, #tpu.memory_space<vmem>>, vector<8x256xf32>
    tpu.vector_store %arg10[%c40_57, %c256_58], %60 {strides = array<i32>} : memref<72x512xf32, #tpu.memory_space<vmem>>, vector<8x256xf32>,
    %c0_59 = arith.constant 0 : index
    %c143_60 = arith.constant 143 : index
    %62 = vector.load %arg8[%c0_59, %c143_60] : memref<8x401xf32, #tpu.memory_space<vmem>>, vector<8x256xf32>
    %63 = vector.broadcast %0 : vector<1x256xf32> to vector<8x256xf32>
    %64 = arith.mulf %62, %63 : vector<8x256xf32>
    %c48_61 = arith.constant 48 : index
    %c256_62 = arith.constant 256 : index
    %65 = vector.load %arg10[%c48_61, %c256_62] : memref<72x512xf32, #tpu.memory_space<vmem>>, vector<8x256xf32>
    tpu.vector_store %arg10[%c48_61, %c256_62], %64 {strides = array<i32>} : memref<72x512xf32, #tpu.memory_space<vmem>>, vector<8x256xf32>,
    %c0_63 = arith.constant 0 : index
    %c144_64 = arith.constant 144 : index
    %66 = vector.load %arg8[%c0_63, %c144_64] : memref<8x401xf32, #tpu.memory_space<vmem>>, vector<8x256xf32>
    %c56_65 = arith.constant 56 : index
    %c256_66 = arith.constant 256 : index
    %67 = vector.load %arg10[%c56_65, %c256_66] : memref<72x512xf32, #tpu.memory_space<vmem>>, vector<8x256xf32>
    tpu.vector_store %arg10[%c56_65, %c256_66], %66 {strides = array<i32>} : memref<72x512xf32, #tpu.memory_space<vmem>>, vector<8x256xf32>,
    %c0_67 = arith.constant 0 : index
    %c145_68 = arith.constant 145 : index
    %68 = vector.load %arg8[%c0_67, %c145_68] : memref<8x401xf32, #tpu.memory_space<vmem>>, vector<8x256xf32>
    %69 = vector.broadcast %1 : vector<1x256xf32> to vector<8x256xf32>
    %70 = arith.mulf %68, %69 : vector<8x256xf32>
    %c64_69 = arith.constant 64 : index
    %c256_70 = arith.constant 256 : index
    %71 = vector.load %arg10[%c64_69, %c256_70] : memref<72x512xf32, #tpu.memory_space<vmem>>, vector<8x256xf32>
    tpu.vector_store %arg10[%c64_69, %c256_70], %70 {strides = array<i32>} : memref<72x512xf32, #tpu.memory_space<vmem>>, vector<8x256xf32>,
    %c0_71 = arith.constant 0 : index
    %c0_72 = arith.constant 0 : index
    %72 = vector.load %arg2[%c0_71, %c0_72] : memref<8x72xf32, #tpu.memory_space<vmem>>, vector<8x72xf32>
    %c0_73 = arith.constant 0 : index
    %c0_74 = arith.constant 0 : index
    %73 = vector.load %arg10[%c0_73, %c0_74] : memref<72x512xf32, #tpu.memory_space<vmem>>, vector<72x512xf32>
    %cst_75 = arith.constant dense<0.000000e+00> : vector<8x512xf32>
    %74 = tpu.matmul %72, %73, %cst_75 {dimension_numbers = #tpu.dot_dimension_numbers<[1], [0], [0], [1], [0, 0, 1, 1], [], []>} : vector<8x72xf32>, vector<72x512xf32>, vector<8x512xf32> -> vector<8x512xf32>
    %c0_76 = arith.constant 0 : index
    %c0_77 = arith.constant 0 : index
    %75 = vector.load %arg4[%c0_76, %c0_77] : memref<8x1xf32, #tpu.memory_space<vmem>>, vector<8x1xf32>
    %c0_78 = arith.constant 0 : index
    %c0_79 = arith.constant 0 : index
    %76 = vector.load %arg5[%c0_78, %c0_79] : memref<8x1xf32, #tpu.memory_space<vmem>>, vector<8x1xf32>
    %77 = vector.extract_strided_slice %74 {offsets = [0, 0], sizes = [8, 256], strides = [1, 1]} : vector<8x512xf32> to vector<8x256xf32>
    %78 = vector.shape_cast %77 : vector<8x256xf32> to vector<1x8x256xf32>
    %cst_80 = arith.constant dense<0.000000e+00> : vector<1xf32>
    %79 = vector.multi_reduction <add>, %78, %cst_80 [1, 2] : vector<1x8x256xf32> to vector<1xf32>
    %80 = vector.shape_cast %79 : vector<1xf32> to vector<1x1x1xf32>
    %81 = vector.extract %80[0, 0, 0] : f32 from vector<1x1x1xf32>
    %82 = vector.broadcast %81 : f32 to vector<1x1xf32>
    %83 = arith.mulf %77, %77 : vector<8x256xf32>
    %84 = vector.shape_cast %83 : vector<8x256xf32> to vector<1x8x256xf32>
    %cst_81 = arith.constant dense<0.000000e+00> : vector<1xf32>
    %85 = vector.multi_reduction <add>, %84, %cst_81 [1, 2] : vector<1x8x256xf32> to vector<1xf32>
    %86 = vector.shape_cast %85 : vector<1xf32> to vector<1x1x1xf32>
    %87 = vector.extract %86[0, 0, 0] : f32 from vector<1x1x1xf32>
    %88 = vector.broadcast %87 : f32 to vector<1x1xf32>
    %cst_82 = arith.constant 4.8828125E-4 : f32
    %89 = vector.broadcast %cst_82 : f32 to vector<1x1xf32>
    %90 = arith.mulf %82, %89 : vector<1x1xf32>
    %cst_83 = arith.constant 4.8828125E-4 : f32
    %91 = vector.broadcast %cst_83 : f32 to vector<1x1xf32>
    %92 = arith.mulf %88, %91 : vector<1x1xf32>
    %93 = arith.mulf %90, %90 : vector<1x1xf32>
    %94 = arith.subf %92, %93 : vector<1x1xf32>
    %cst_84 = arith.constant 9.99999974E-6 : f32
    %95 = vector.broadcast %cst_84 : f32 to vector<1x1xf32>
    %96 = arith.addf %94, %95 : vector<1x1xf32>
    %97 = math.rsqrt %96 : vector<1x1xf32>
    %98 = vector.broadcast %97 : vector<1x1xf32> to vector<8x1xf32>
    %99 = arith.mulf %75, %98 : vector<8x1xf32>
    %100 = vector.broadcast %90 : vector<1x1xf32> to vector<8x1xf32>
    %101 = arith.mulf %100, %99 : vector<8x1xf32>
    %102 = arith.subf %76, %101 : vector<8x1xf32>
    %103 = vector.broadcast %99 : vector<8x1xf32> to vector<8x256xf32>
    %104 = arith.mulf %77, %103 : vector<8x256xf32>
    %105 = vector.broadcast %102 : vector<8x1xf32> to vector<8x256xf32>
    %106 = arith.addf %104, %105 : vector<8x256xf32>
    %cst_85 = arith.constant 0.00999999977 : f32
    %107 = vector.broadcast %cst_85 : f32 to vector<8x256xf32>
    %108 = arith.mulf %107, %106 : vector<8x256xf32>
    %109 = arith.maximumf %106, %108 : vector<8x256xf32>
    %c0_86 = arith.constant 0 : index
    %c128_87 = arith.constant 128 : index
    %110 = vector.load %arg9[%c0_86, %c128_87] : memref<8x401xf32, #tpu.memory_space<vmem>>, vector<8x256xf32>
    tpu.vector_store %arg9[%c0_86, %c128_87], %109 {strides = array<i32>} : memref<8x401xf32, #tpu.memory_space<vmem>>, vector<8x256xf32>,
    %c0_88 = arith.constant 0 : index
    %c111_89 = arith.constant 111 : index
    %111 = vector.load %arg9[%c0_88, %c111_89] : memref<8x401xf32, #tpu.memory_space<vmem>>, vector<8x256xf32>
    %112 = vector.broadcast %0 : vector<1x256xf32> to vector<8x256xf32>
    %113 = arith.mulf %111, %112 : vector<8x256xf32>
    %c0_90 = arith.constant 0 : index
    %c0_91 = arith.constant 0 : index
    %114 = vector.load %arg11[%c0_90, %c0_91] : memref<72x512xf32, #tpu.memory_space<vmem>>, vector<8x256xf32>
    tpu.vector_store %arg11[%c0_90, %c0_91], %113 {strides = array<i32>} : memref<72x512xf32, #tpu.memory_space<vmem>>, vector<8x256xf32>,
    %c0_92 = arith.constant 0 : index
    %c112_93 = arith.constant 112 : index
    %115 = vector.load %arg9[%c0_92, %c112_93] : memref<8x401xf32, #tpu.memory_space<vmem>>, vector<8x256xf32>
    %c8_94 = arith.constant 8 : index
    %c0_95 = arith.constant 0 : index
    %116 = vector.load %arg11[%c8_94, %c0_95] : memref<72x512xf32, #tpu.memory_space<vmem>>, vector<8x256xf32>
    tpu.vector_store %arg11[%c8_94, %c0_95], %115 {strides = array<i32>} : memref<72x512xf32, #tpu.memory_space<vmem>>, vector<8x256xf32>,
    %c0_96 = arith.constant 0 : index
    %c113_97 = arith.constant 113 : index
    %117 = vector.load %arg9[%c0_96, %c113_97] : memref<8x401xf32, #tpu.memory_space<vmem>>, vector<8x256xf32>
    %118 = vector.broadcast %1 : vector<1x256xf32> to vector<8x256xf32>
    %119 = arith.mulf %117, %118 : vector<8x256xf32>
    %c16_98 = arith.constant 16 : index
    %c0_99 = arith.constant 0 : index
    %120 = vector.load %arg11[%c16_98, %c0_99] : memref<72x512xf32, #tpu.memory_space<vmem>>, vector<8x256xf32>
    tpu.vector_store %arg11[%c16_98, %c0_99], %119 {strides = array<i32>} : memref<72x512xf32, #tpu.memory_space<vmem>>, vector<8x256xf32>,
    %c0_100 = arith.constant 0 : index
    %c127_101 = arith.constant 127 : index
    %121 = vector.load %arg9[%c0_100, %c127_101] : memref<8x401xf32, #tpu.memory_space<vmem>>, vector<8x256xf32>
    %122 = vector.broadcast %0 : vector<1x256xf32> to vector<8x256xf32>
    %123 = arith.mulf %121, %122 : vector<8x256xf32>
    %c24_102 = arith.constant 24 : index
    %c0_103 = arith.constant 0 : index
    %124 = vector.load %arg11[%c24_102, %c0_103] : memref<72x512xf32, #tpu.memory_space<vmem>>, vector<8x256xf32>
    tpu.vector_store %arg11[%c24_102, %c0_103], %123 {strides = array<i32>} : memref<72x512xf32, #tpu.memory_space<vmem>>, vector<8x256xf32>,
    %c0_104 = arith.constant 0 : index
    %c128_105 = arith.constant 128 : index
    %125 = vector.load %arg9[%c0_104, %c128_105] : memref<8x401xf32, #tpu.memory_space<vmem>>, vector<8x256xf32>
    %c32_106 = arith.constant 32 : index
    %c0_107 = arith.constant 0 : index
    %126 = vector.load %arg11[%c32_106, %c0_107] : memref<72x512xf32, #tpu.memory_space<vmem>>, vector<8x256xf32>
    tpu.vector_store %arg11[%c32_106, %c0_107], %125 {strides = array<i32>} : memref<72x512xf32, #tpu.memory_space<vmem>>, vector<8x256xf32>,
    %c0_108 = arith.constant 0 : index
    %c129_109 = arith.constant 129 : index
    %127 = vector.load %arg9[%c0_108, %c129_109] : memref<8x401xf32, #tpu.memory_space<vmem>>, vector<8x256xf32>
    %128 = vector.broadcast %1 : vector<1x256xf32> to vector<8x256xf32>
    %129 = arith.mulf %127, %128 : vector<8x256xf32>
    %c40_110 = arith.constant 40 : index
    %c0_111 = arith.constant 0 : index
    %130 = vector.load %arg11[%c40_110, %c0_111] : memref<72x512xf32, #tpu.memory_space<vmem>>, vector<8x256xf32>
    tpu.vector_store %arg11[%c40_110, %c0_111], %129 {strides = array<i32>} : memref<72x512xf32, #tpu.memory_space<vmem>>, vector<8x256xf32>,
    %c0_112 = arith.constant 0 : index
    %c143_113 = arith.constant 143 : index
    %131 = vector.load %arg9[%c0_112, %c143_113] : memref<8x401xf32, #tpu.memory_space<vmem>>, vector<8x256xf32>
    %132 = vector.broadcast %0 : vector<1x256xf32> to vector<8x256xf32>
    %133 = arith.mulf %131, %132 : vector<8x256xf32>
    %c48_114 = arith.constant 48 : index
    %c0_115 = arith.constant 0 : index
    %134 = vector.load %arg11[%c48_114, %c0_115] : memref<72x512xf32, #tpu.memory_space<vmem>>, vector<8x256xf32>
    tpu.vector_store %arg11[%c48_114, %c0_115], %133 {strides = array<i32>} : memref<72x512xf32, #tpu.memory_space<vmem>>, vector<8x256xf32>,
    %c0_116 = arith.constant 0 : index
    %c144_117 = arith.constant 144 : index
    %135 = vector.load %arg9[%c0_116, %c144_117] : memref<8x401xf32, #tpu.memory_space<vmem>>, vector<8x256xf32>
    %c56_118 = arith.constant 56 : index
    %c0_119 = arith.constant 0 : index
    %136 = vector.load %arg11[%c56_118, %c0_119] : memref<72x512xf32, #tpu.memory_space<vmem>>, vector<8x256xf32>
    tpu.vector_store %arg11[%c56_118, %c0_119], %135 {strides = array<i32>} : memref<72x512xf32, #tpu.memory_space<vmem>>, vector<8x256xf32>,
    %c0_120 = arith.constant 0 : index
    %c145_121 = arith.constant 145 : index
    %137 = vector.load %arg9[%c0_120, %c145_121] : memref<8x401xf32, #tpu.memory_space<vmem>>, vector<8x256xf32>
    %138 = vector.broadcast %1 : vector<1x256xf32> to vector<8x256xf32>
    %139 = arith.mulf %137, %138 : vector<8x256xf32>
    %c64_122 = arith.constant 64 : index
    %c0_123 = arith.constant 0 : index
    %140 = vector.load %arg11[%c64_122, %c0_123] : memref<72x512xf32, #tpu.memory_space<vmem>>, vector<8x256xf32>
    tpu.vector_store %arg11[%c64_122, %c0_123], %139 {strides = array<i32>} : memref<72x512xf32, #tpu.memory_space<vmem>>, vector<8x256xf32>,
    %141 = vector.extract_strided_slice %74 {offsets = [0, 256], sizes = [8, 256], strides = [1, 1]} : vector<8x512xf32> to vector<8x256xf32>
    %142 = vector.shape_cast %141 : vector<8x256xf32> to vector<1x8x256xf32>
    %cst_124 = arith.constant dense<0.000000e+00> : vector<1xf32>
    %143 = vector.multi_reduction <add>, %142, %cst_124 [1, 2] : vector<1x8x256xf32> to vector<1xf32>
    %144 = vector.shape_cast %143 : vector<1xf32> to vector<1x1x1xf32>
    %145 = vector.extract %144[0, 0, 0] : f32 from vector<1x1x1xf32>
    %146 = vector.broadcast %145 : f32 to vector<1x1xf32>
    %147 = arith.mulf %141, %141 : vector<8x256xf32>
    %148 = vector.shape_cast %147 : vector<8x256xf32> to vector<1x8x256xf32>
    %cst_125 = arith.constant dense<0.000000e+00> : vector<1xf32>
    %149 = vector.multi_reduction <add>, %148, %cst_125 [1, 2] : vector<1x8x256xf32> to vector<1xf32>
    %150 = vector.shape_cast %149 : vector<1xf32> to vector<1x1x1xf32>
    %151 = vector.extract %150[0, 0, 0] : f32 from vector<1x1x1xf32>
    %152 = vector.broadcast %151 : f32 to vector<1x1xf32>
    %cst_126 = arith.constant 4.8828125E-4 : f32
    %153 = vector.broadcast %cst_126 : f32 to vector<1x1xf32>
    %154 = arith.mulf %146, %153 : vector<1x1xf32>
    %cst_127 = arith.constant 4.8828125E-4 : f32
    %155 = vector.broadcast %cst_127 : f32 to vector<1x1xf32>
    %156 = arith.mulf %152, %155 : vector<1x1xf32>
    %157 = arith.mulf %154, %154 : vector<1x1xf32>
    %158 = arith.subf %156, %157 : vector<1x1xf32>
    %cst_128 = arith.constant 9.99999974E-6 : f32
    %159 = vector.broadcast %cst_128 : f32 to vector<1x1xf32>
    %160 = arith.addf %158, %159 : vector<1x1xf32>
    %161 = math.rsqrt %160 : vector<1x1xf32>
    %162 = vector.broadcast %161 : vector<1x1xf32> to vector<8x1xf32>
    %163 = arith.mulf %75, %162 : vector<8x1xf32>
    %164 = vector.broadcast %154 : vector<1x1xf32> to vector<8x1xf32>
    %165 = arith.mulf %164, %163 : vector<8x1xf32>
    %166 = arith.subf %76, %165 : vector<8x1xf32>
    %167 = vector.broadcast %163 : vector<8x1xf32> to vector<8x256xf32>
    %168 = arith.mulf %141, %167 : vector<8x256xf32>
    %169 = vector.broadcast %166 : vector<8x1xf32> to vector<8x256xf32>
    %170 = arith.addf %168, %169 : vector<8x256xf32>
    %cst_129 = arith.constant 0.00999999977 : f32
    %171 = vector.broadcast %cst_129 : f32 to vector<8x256xf32>
    %172 = arith.mulf %171, %170 : vector<8x256xf32>
    %173 = arith.maximumf %170, %172 : vector<8x256xf32>
    %c0_130 = arith.constant 0 : index
    %c128_131 = arith.constant 128 : index
    %174 = vector.load %arg9[%c0_130, %c128_131] : memref<8x401xf32, #tpu.memory_space<vmem>>, vector<8x256xf32>
    tpu.vector_store %arg9[%c0_130, %c128_131], %173 {strides = array<i32>} : memref<8x401xf32, #tpu.memory_space<vmem>>, vector<8x256xf32>,
    %c0_132 = arith.constant 0 : index
    %c111_133 = arith.constant 111 : index
    %175 = vector.load %arg9[%c0_132, %c111_133] : memref<8x401xf32, #tpu.memory_space<vmem>>, vector<8x256xf32>
    %176 = vector.broadcast %0 : vector<1x256xf32> to vector<8x256xf32>
    %177 = arith.mulf %175, %176 : vector<8x256xf32>
    %c0_134 = arith.constant 0 : index
    %c256_135 = arith.constant 256 : index
    %178 = vector.load %arg11[%c0_134, %c256_135] : memref<72x512xf32, #tpu.memory_space<vmem>>, vector<8x256xf32>
    tpu.vector_store %arg11[%c0_134, %c256_135], %177 {strides = array<i32>} : memref<72x512xf32, #tpu.memory_space<vmem>>, vector<8x256xf32>,
    %c0_136 = arith.constant 0 : index
    %c112_137 = arith.constant 112 : index
    %179 = vector.load %arg9[%c0_136, %c112_137] : memref<8x401xf32, #tpu.memory_space<vmem>>, vector<8x256xf32>
    %c8_138 = arith.constant 8 : index
    %c256_139 = arith.constant 256 : index
    %180 = vector.load %arg11[%c8_138, %c256_139] : memref<72x512xf32, #tpu.memory_space<vmem>>, vector<8x256xf32>
    tpu.vector_store %arg11[%c8_138, %c256_139], %179 {strides = array<i32>} : memref<72x512xf32, #tpu.memory_space<vmem>>, vector<8x256xf32>,
    %c0_140 = arith.constant 0 : index
    %c113_141 = arith.constant 113 : index
    %181 = vector.load %arg9[%c0_140, %c113_141] : memref<8x401xf32, #tpu.memory_space<vmem>>, vector<8x256xf32>
    %182 = vector.broadcast %1 : vector<1x256xf32> to vector<8x256xf32>
    %183 = arith.mulf %181, %182 : vector<8x256xf32>
    %c16_142 = arith.constant 16 : index
    %c256_143 = arith.constant 256 : index
    %184 = vector.load %arg11[%c16_142, %c256_143] : memref<72x512xf32, #tpu.memory_space<vmem>>, vector<8x256xf32>
    tpu.vector_store %arg11[%c16_142, %c256_143], %183 {strides = array<i32>} : memref<72x512xf32, #tpu.memory_space<vmem>>, vector<8x256xf32>,
    %c0_144 = arith.constant 0 : index
    %c127_145 = arith.constant 127 : index
    %185 = vector.load %arg9[%c0_144, %c127_145] : memref<8x401xf32, #tpu.memory_space<vmem>>, vector<8x256xf32>
    %186 = vector.broadcast %0 : vector<1x256xf32> to vector<8x256xf32>
    %187 = arith.mulf %185, %186 : vector<8x256xf32>
    %c24_146 = arith.constant 24 : index
    %c256_147 = arith.constant 256 : index
    %188 = vector.load %arg11[%c24_146, %c256_147] : memref<72x512xf32, #tpu.memory_space<vmem>>, vector<8x256xf32>
    tpu.vector_store %arg11[%c24_146, %c256_147], %187 {strides = array<i32>} : memref<72x512xf32, #tpu.memory_space<vmem>>, vector<8x256xf32>,
    %c0_148 = arith.constant 0 : index
    %c128_149 = arith.constant 128 : index
    %189 = vector.load %arg9[%c0_148, %c128_149] : memref<8x401xf32, #tpu.memory_space<vmem>>, vector<8x256xf32>
    %c32_150 = arith.constant 32 : index
    %c256_151 = arith.constant 256 : index
    %190 = vector.load %arg11[%c32_150, %c256_151] : memref<72x512xf32, #tpu.memory_space<vmem>>, vector<8x256xf32>
    tpu.vector_store %arg11[%c32_150, %c256_151], %189 {strides = array<i32>} : memref<72x512xf32, #tpu.memory_space<vmem>>, vector<8x256xf32>,
    %c0_152 = arith.constant 0 : index
    %c129_153 = arith.constant 129 : index
    %191 = vector.load %arg9[%c0_152, %c129_153] : memref<8x401xf32, #tpu.memory_space<vmem>>, vector<8x256xf32>
    %192 = vector.broadcast %1 : vector<1x256xf32> to vector<8x256xf32>
    %193 = arith.mulf %191, %192 : vector<8x256xf32>
    %c40_154 = arith.constant 40 : index
    %c256_155 = arith.constant 256 : index
    %194 = vector.load %arg11[%c40_154, %c256_155] : memref<72x512xf32, #tpu.memory_space<vmem>>, vector<8x256xf32>
    tpu.vector_store %arg11[%c40_154, %c256_155], %193 {strides = array<i32>} : memref<72x512xf32, #tpu.memory_space<vmem>>, vector<8x256xf32>,
    %c0_156 = arith.constant 0 : index
    %c143_157 = arith.constant 143 : index
    %195 = vector.load %arg9[%c0_156, %c143_157] : memref<8x401xf32, #tpu.memory_space<vmem>>, vector<8x256xf32>
    %196 = vector.broadcast %0 : vector<1x256xf32> to vector<8x256xf32>
    %197 = arith.mulf %195, %196 : vector<8x256xf32>
    %c48_158 = arith.constant 48 : index
    %c256_159 = arith.constant 256 : index
    %198 = vector.load %arg11[%c48_158, %c256_159] : memref<72x512xf32, #tpu.memory_space<vmem>>, vector<8x256xf32>
    tpu.vector_store %arg11[%c48_158, %c256_159], %197 {strides = array<i32>} : memref<72x512xf32, #tpu.memory_space<vmem>>, vector<8x256xf32>,
    %c0_160 = arith.constant 0 : index
    %c144_161 = arith.constant 144 : index
    %199 = vector.load %arg9[%c0_160, %c144_161] : memref<8x401xf32, #tpu.memory_space<vmem>>, vector<8x256xf32>
    %c56_162 = arith.constant 56 : index
    %c256_163 = arith.constant 256 : index
    %200 = vector.load %arg11[%c56_162, %c256_163] : memref<72x512xf32, #tpu.memory_space<vmem>>, vector<8x256xf32>
    tpu.vector_store %arg11[%c56_162, %c256_163], %199 {strides = array<i32>} : memref<72x512xf32, #tpu.memory_space<vmem>>, vector<8x256xf32>,
    %c0_164 = arith.constant 0 : index
    %c145_165 = arith.constant 145 : index
    %201 = vector.load %arg9[%c0_164, %c145_165] : memref<8x401xf32, #tpu.memory_space<vmem>>, vector<8x256xf32>
    %202 = vector.broadcast %1 : vector<1x256xf32> to vector<8x256xf32>
    %203 = arith.mulf %201, %202 : vector<8x256xf32>
    %c64_166 = arith.constant 64 : index
    %c256_167 = arith.constant 256 : index
    %204 = vector.load %arg11[%c64_166, %c256_167] : memref<72x512xf32, #tpu.memory_space<vmem>>, vector<8x256xf32>
    tpu.vector_store %arg11[%c64_166, %c256_167], %203 {strides = array<i32>} : memref<72x512xf32, #tpu.memory_space<vmem>>, vector<8x256xf32>,
    %c0_168 = arith.constant 0 : index
    %c0_169 = arith.constant 0 : index
    %205 = vector.load %arg3[%c0_168, %c0_169] : memref<8x72xf32, #tpu.memory_space<vmem>>, vector<8x72xf32>
    %c0_170 = arith.constant 0 : index
    %c0_171 = arith.constant 0 : index
    %206 = vector.load %arg11[%c0_170, %c0_171] : memref<72x512xf32, #tpu.memory_space<vmem>>, vector<72x512xf32>
    %cst_172 = arith.constant dense<0.000000e+00> : vector<8x512xf32>
    %207 = tpu.matmul %205, %206, %cst_172 {dimension_numbers = #tpu.dot_dimension_numbers<[1], [0], [0], [1], [0, 0, 1, 1], [], []>} : vector<8x72xf32>, vector<72x512xf32>, vector<8x512xf32> -> vector<8x512xf32>
    %cst_173 = arith.constant 0.00999999977 : f32
    %208 = vector.broadcast %cst_173 : f32 to vector<8x512xf32>
    %209 = arith.mulf %208, %207 : vector<8x512xf32>
    %210 = arith.maximumf %207, %209 : vector<8x512xf32>
    %211 = vector.extract_strided_slice %210 {offsets = [0, 0], sizes = [8, 256], strides = [1, 1]} : vector<8x512xf32> to vector<8x256xf32>
    %c0_174 = arith.constant 0 : index
    %c0_175 = arith.constant 0 : index
    %c0_176 = arith.constant 0 : index
    %212 = vector.load %arg7[%c0_174, %c0_175, %c0_176] : memref<2x8x256xf32, #tpu.memory_space<vmem>>, vector<1x8x256xf32>
    %213 = vector.shape_cast %212 : vector<1x8x256xf32> to vector<8x256xf32>
    %214 = vector.shape_cast %211 : vector<8x256xf32> to vector<1x8x256xf32>
    tpu.vector_store %arg7[%c0_174, %c0_175, %c0_176], %214 {strides = array<i32>} : memref<2x8x256xf32, #tpu.memory_space<vmem>>, vector<1x8x256xf32>,
    %215 = vector.extract_strided_slice %210 {offsets = [0, 256], sizes = [8, 256], strides = [1, 1]} : vector<8x512xf32> to vector<8x256xf32>
    %c1_177 = arith.constant 1 : index
    %c0_178 = arith.constant 0 : index
    %c0_179 = arith.constant 0 : index
    %216 = vector.load %arg7[%c1_177, %c0_178, %c0_179] : memref<2x8x256xf32, #tpu.memory_space<vmem>>, vector<1x8x256xf32>
    %217 = vector.shape_cast %216 : vector<1x8x256xf32> to vector<8x256xf32>
    %218 = vector.shape_cast %215 : vector<8x256xf32> to vector<1x8x256xf32>
    tpu.vector_store %arg7[%c1_177, %c0_178, %c0_179], %218 {strides = array<i32>} : memref<2x8x256xf32, #tpu.memory_space<vmem>>, vector<1x8x256xf32>,
    return
  }
  func.func @transform_0(%arg0: i32) -> (i32, i32, i32) {
    %c0_i32 = arith.constant 0 : i32
    %c0_i32_0 = arith.constant 0 : i32
    %c0_i32_1 = arith.constant 0 : i32
    return %arg0, %c0_i32, %c0_i32_0 : i32, i32, i32
  }
  func.func @transform_1(%arg0: i32) -> (i32, i32) {
    %c0_i32 = arith.constant 0 : i32
    %c0_i32_0 = arith.constant 0 : i32
    %c0_i32_1 = arith.constant 0 : i32
    return %c0_i32, %c0_i32_0 : i32, i32
  }
  func.func @transform_2(%arg0: i32) -> (i32, i32) {
    %c0_i32 = arith.constant 0 : i32
    %c0_i32_0 = arith.constant 0 : i32
    %c0_i32_1 = arith.constant 0 : i32
    return %c0_i32, %c0_i32_0 : i32, i32
  }
  func.func @transform_3(%arg0: i32) -> (i32, i32) {
    %c0_i32 = arith.constant 0 : i32
    %c0_i32_0 = arith.constant 0 : i32
    %c0_i32_1 = arith.constant 0 : i32
    return %c0_i32, %c0_i32_0 : i32, i32
  }
  func.func @transform_4(%arg0: i32) -> (i32, i32) {
    %c0_i32 = arith.constant 0 : i32
    %c0_i32_0 = arith.constant 0 : i32
    %c0_i32_1 = arith.constant 0 : i32
    return %c0_i32, %c0_i32_0 : i32, i32
  }
  func.func @transform_5(%arg0: i32) -> (i32, i32) {
    %c0_i32 = arith.constant 0 : i32
    %c0_i32_0 = arith.constant 0 : i32
    %c0_i32_1 = arith.constant 0 : i32
    return %c0_i32, %c0_i32_0 : i32, i32
  }
  func.func @transform_6(%arg0: i32) -> (i32, i32, i32) {
    %c0_i32 = arith.constant 0 : i32
    %c0_i32_0 = arith.constant 0 : i32
    %c0_i32_1 = arith.constant 0 : i32
    return %arg0, %c0_i32, %c0_i32_0 : i32, i32, i32
  }
}

</mosaic_0001>

<bundles_post_ra>
// kernel: tpu_custom_call.1
= control target key start
LH: loop header
LB: loop body
LE: loop exit
PB: predicated region body
PF: predicated region fallthrough
CT: control target
= control target key end

     0   :  { %11 = vsyncpa [#allocation7], 0  ;;  %s2050_s0 = inlined_call_operand.hbm [shape: f32[2,8,256], index: 0, kind: input, shape index: {}]   ;;  %s2051_s1 = inlined_call_operand.vmem [shape: f32[8,72], index: 1, kind: input, shape index: {}]   ;;  %s2052_s2 = inlined_call_operand.vmem [shape: f32[8,72], index: 2, kind: input, shape index: {}]   ;;  %s2053_s3 = inlined_call_operand.vmem [shape: f32[8,1], index: 3, kind: input, shape index: {}]   ;;  %s2054_s4 = inlined_call_operand.vmem [shape: f32[8,1], index: 4, kind: input, shape index: {}]   ;;  %s2055_s5 = inlined_call_operand.hbm [shape: f32[2,256], index: 5, kind: input, shape index: {}]   ;;  %s2056_s6 = inlined_call_operand.hbm [shape: f32[2,8,256], index: 6, kind: output, shape index: {}]  }
   0x1   :  { %12 = vsyncpa [#allocation10], 0 }
   0x2   :  { %13 = vsyncpa [#allocation8], 0  ;;  %s18_s23 = sshll.u32 %s2050_s0, 4  ;;  %s1555_s24 = smov [#allocation6]   ;;  %s19_s23 = int_to_ptr.hbm [resolvable:$true] %s18_s23 }
   0x3   :  { %s20_s25 = sshll.u32 %s1555_s24, 4  ;;  %s40_s28 = sshll.u32 %s2055_s5, 4  ;;  %s21_s25 = int_to_ptr.vmem [resolvable:$true] %s20_s25  ;;  %s41_s28 = int_to_ptr.hbm [resolvable:$true] %s40_s28 }
   0x4   :  { %s1556_s29 = smov 256   ;;  %s1557_s30 = smov 16  }
   0x5   :  { %26 = dma.hbm_to_vmem [thread:$0]  %s19_s23, 512, %s21_s25, [#allocation7], %s1556_s29, %s1556_s29, %s1557_s30  }
   0x6   :  { %s1558_s7 = smov [#allocation9]  }
   0x7   :  { %s42_s8 = sshll.u32 %s1558_s7, 4  ;;  %s43_s8 = int_to_ptr.vmem [resolvable:$true] %s42_s8 }
   0x8   :  { %45 = dma.hbm_to_vmem [thread:$0]  %s41_s28, 64, %s43_s8, [#allocation10]  }
   0x9   :  { %1549 = dma.done.wait [#allocation7], 512  }
   0xa   :  { %1550 = vsyncadd [#allocation7], 4294966784 }
   0xb   :  { %1551 = dma.done.wait [#allocation10], 64  }
   0xc   :  { %1552 = vsyncadd [#allocation10], 4294967232  ;;  %vm60_vm0 = vcmask 138240   ;;  %v1559_v0 = vmov 0.0   ;;  %v1615_v5 = vld [vmem:[#allocation6 + $0x10] sm:$0xff]  ;;  %s1560_s0 = smov 17  }
   0xd   :  { %61 = vst.msk [vmem:[#allocation2 + $0x18] sm:$0xff] %vm60_vm0, %v1559_v0  ;;  %v56_v1 = vld [vmem:[#allocation9 + $0x1] ss:$2 sm:$0x3]  ;;  %s1561_s5 = smov 15   ;;  %v1621_v6 = vld [vmem:[#allocation6 + $0x18] sm:$0xff] }
   0xe   :  { %v54_v2 = vld [vmem:[#allocation9] ss:$2 sm:$0x3]  ;;  %v126_v3 = vperm.slane %v56_v1, 0  ;;  %65 = vst.msk [vmem:[#allocation3 + $0x18] sm:$0xff] %vm60_vm0, %v1559_v0  ;;  %s1562_s9 = smov 1  }
   0xf   :  { %v74_v4 = vperm.slane %v54_v2, 0  ;;  %v127_v7 = vperm.slane %v56_v1, 1  ;;  %v75_v8 = vperm.slane %v54_v2, 1  ;;  %s1563_s10 = smov 127   ;;  %s1564_s11 = smov 113   ;;  %v1633_v10 = vld [vmem:[#allocation6] sm:$0xff] }
  0x10   :  { %271 = vrot.lane.b32.xlu0 %v126_v3, %s1560_s0  ;;  %194 = vrot.lane.b32.xlu2 %v126_v3, %s1562_s9  ;;  %s1565_s12 = smov 111   ;;  %v1635_v11 = vld [vmem:[#allocation6 + $0x8] sm:$0xff]  ;;  %s1566_s13 = smov 112   ;;  %v1245_v16 = vpack.i.bf16 %v1633_v10, %v1559_v0  ;;  %vm149_vm1 = vcmask 121856   ;;  %vm180_vm2 = vcmask 7168   ;;  %vm132_vm3 = vcmask 924672  }
  0x11   :  { %223 = vrot.lane.b32.xlu1 %v74_v4, %s1561_s5  ;;  %v1230_v14 = vpack.i.bf16 %v1635_v11, %v1633_v10  ;;  %v1250_v15 = vpack.i.bf16 0.0, %v1635_v11  ;;  %vm80_vm4 = vcmask 908288   ;;  %vm163_vm5 = vcmask 1039360   ;;  %s1186_s26 = sshll.u32 %s2056_s6, 4  ;;  %s1187_s26 = int_to_ptr.hbm [resolvable:$true] %s1186_s26 }
  0x12   :  { %vm261_vm6 = vcmask 916480   ;;  %vm115_vm7 = vcmask 130048   ;;  %vm505_vm8 = vcmask 588800  }
  0x14   :  { %v251_v9 = vld [vmem:[#allocation2 + $0x18] sm:$0xff] }
  0x15   :  { %v1235_v12 = vpack.i.bf16 %v1615_v5, %v251_v9  ;;  %v1240_v13 = vpack.i.bf16 %v251_v9, %v1621_v6 }
  0x18   :  { %273 = vrot.lane.b32.xlu0 %v127_v7, %s1560_s0  ;;  %196 = vrot.lane.b32.xlu2 %v127_v7, %s1562_s9 }
  0x19   :  { %225 = vrot.lane.b32.xlu1 %v75_v8, %s1561_s5 }
  0x20   :  { %159 = vrot.lane.b32.xlu0 %v74_v4, %s1563_s10  ;;  %128 = vrot.lane.b32.xlu2 %v126_v3, %s1564_s11 }
  0x21   :  { %161 = vrot.lane.b32.xlu1 %v75_v8, %s1563_s10 }
  0x28   :  { %130 = vrot.lane.b32.xlu0 %v127_v7, %s1564_s11  ;;  %78 = vrot.lane.b32.xlu2 %v75_v8, %s1565_s12 }
  0x29   :  { %76 = vrot.lane.b32.xlu1 %v74_v4, %s1565_s12 }
  0x30   :  { %1236 = vrot.lane.b32.xlu0 %v1235_v12, %s1566_s13  ;;  %1231 = vrot.lane.b32.xlu2 %v1230_v14, %s1566_s13 }
  0x31   :  { %1241 = vrot.lane.b32.xlu1 %v1240_v13, %s1566_s13 }
  0x38   :  { %1251 = vrot.lane.b32.xlu0 %v1250_v15, %s1557_s30  ;;  %1246 = vrot.lane.b32.xlu2 %v1245_v16, %s1557_s30 }
  0x6a   :  { %v1649_v17 = vpop.permute.xlu2 %194 }
  0x6b   :  { %v390_v35 = vmul.f32 %v1615_v5, %v1649_v17  ;;  %v202_v38 = vmul.f32 %v1649_v17, %v1633_v10 }
  0x72   :  { %v1670_v27 = vpop.permute.xlu2 %196 }
  0x73   :  { %v1679_v33 = vsel %vm180_vm2, %v1649_v17, %v1670_v27  ;;  %v204_v34 = vmul.f32 %v251_v9, %v1670_v27 }
  0x74   :  { %v203_v39 = vmul.f32 %v1679_v33, %v1635_v11  ;;  %v391_v50 = vmul.f32 %v1621_v6, %v1679_v33 }
  0x75   :  { %v1265_v42 = vpack.i.bf16 %v390_v35, %v204_v34 }
  0x76   :  { %v1295_v45 = vpack.i.bf16 %v203_v39, %v202_v38  ;;  %v1305_v54 = vpack.i.bf16 %v204_v34, %v391_v50 }
  0x7a   :  { %v129_v46 = vpop.permute.xlu2 %128 }
  0x7b   :  { %v1706_v47 = vmul.f32 0.0, %v129_v46 }
  0x82   :  { %v1651_v18 = vpop.permute.xlu0 %271  ;;  %v1730_v59 = vpop.permute.xlu2 %78 }
  0x83   :  { %v1653_v19 = vpop.permute.xlu1 %223  ;;  %v450_v22 = vmul.f32 %v1615_v5, %v1651_v18  ;;  %v279_v61 = vmul.f32 %v1651_v18, %v1633_v10  ;;  %v87_v16 = vmul.f32 %v1730_v59, %v1635_v11 }
  0x84   :  { %v411_v26 = vmul.f32 %v1615_v5, %v1653_v19  ;;  %v231_v28 = vmul.f32 %v1653_v19, %v1633_v10 }
  0x8a   :  { %v1655_v20 = vpop.permute.xlu0 %273 }
  0x8b   :  { %v1657_v21 = vpop.permute.xlu1 %225  ;;  %v281_v24 = vmul.f32 %v1655_v20, %v251_v9  ;;  %v1701_v44 = vsel %vm60_vm0, %v1651_v18, %v1655_v20 }
  0x8c   :  { %v1664_v23 = vsel %vm149_vm1, %v1653_v19, %v1657_v21  ;;  %v233_v25 = vmul.f32 %v251_v9, %v1657_v21  ;;  %v451_v48 = vmul.f32 %v1621_v6, %v1701_v44  ;;  %v280_v56 = vmul.f32 %v1701_v44, %v1635_v11 }
  0x8d   :  { %v232_v29 = vmul.f32 %v1664_v23, %v1635_v11  ;;  %v1255_v30 = vpack.i.bf16 %v450_v22, %v281_v24  ;;  %v412_v57 = vmul.f32 %v1621_v6, %v1664_v23 }
  0x8e   :  { %v1260_v31 = vpack.i.bf16 %v411_v26, %v233_v25  ;;  %v1285_v53 = vpack.i.bf16 %v281_v24, %v451_v48  ;;  %v1280_v62 = vpack.i.bf16 %v280_v56, %v279_v61  ;;  %v307_v24 = vmul.f32 %v1621_v6, %v1730_v59 }
  0x8f   :  { %v1290_v32 = vpack.i.bf16 %v232_v29, %v231_v28  ;;  %1256 = vrot.lane.b32.xlu1 %v1255_v30, %s1565_s12  ;;  %v1300_v63 = vpack.i.bf16 %v233_v25, %v412_v57 }
  0x90   :  { %1261 = vrot.lane.b32.xlu0 %v1260_v31, %s1564_s11  ;;  %v1335_v31 = vpack.i.bf16 %v1621_v6, %v1615_v5 }
  0x91   :  { %1291 = vrot.lane.b32.xlu2 %v1290_v32, %s1564_s11  ;;  %v1232_v32 = vpop.permute.xlu2 %1231 }
  0x92   :  { %v160_v36 = vpop.permute.xlu0 %159 }
  0x93   :  { %v1687_v37 = vpop.permute.xlu1 %161  ;;  %v1695_v41 = vmul.f32 0.0, %v160_v36 }
  0x94   :  { %v170_v40 = vmul.f32 %v1687_v37, %v1635_v11  ;;  %v1740_v2 = vsel %vm163_vm5, %v160_v36, %v1687_v37  ;;  %v367_v9 = vmul.f32 %v1621_v6, %v1687_v37 }
  0x95   :  { %v366_v8 = vmul.f32 %v1615_v5, %v1740_v2  ;;  %v169_v12 = vmul.f32 %v1740_v2, %v1633_v10 }
  0x96   :  { %v1270_v43 = vpack.i.bf16 %v1695_v41, %v170_v40 }
  0x97   :  { %v1325_v14 = vpack.i.bf16 %v367_v9, %v366_v8  ;;  %v1310_v15 = vpack.i.bf16 %v169_v12, %v1695_v41 }
  0x98   :  { %1266 = vrot.lane.b32.xlu0 %v1265_v42, %s1563_s10  ;;  %1271 = vrot.lane.b32.xlu1 %v1270_v43, %s1562_s9 }
  0x99   :  { %1296 = vrot.lane.b32.xlu2 %v1295_v45, %s1563_s10  ;;  %v1778_v35 = vpop.permute.xlu2 %1246 }
  0x9a   :  { %v1710_v49 = vpop.permute.xlu0 %130 }
  0x9b   :  { %v139_v51 = vmul.f32 %v1710_v49, %v1635_v11  ;;  %v1719_v55 = vsel %vm132_vm3, %v129_v46, %v1710_v49  ;;  %v77_v60 = vpop.permute.xlu1 %76  ;;  %v346_v26 = vmul.f32 %v1621_v6, %v1710_v49 }
  0x9c   :  { %v138_v58 = vmul.f32 %v1719_v55, %v1633_v10  ;;  %v1736_v1 = vsel %vm80_vm4, %v77_v60, %v1730_v59  ;;  %v1746_v4 = vmul.f32 0.0, %v77_v60  ;;  %v345_v25 = vmul.f32 %v1615_v5, %v1719_v55 }
  0x9d   :  { %v1275_v52 = vpack.i.bf16 %v1706_v47, %v139_v51  ;;  %v86_v7 = vmul.f32 %v1736_v1, %v1633_v10  ;;  %v306_v22 = vmul.f32 %v1615_v5, %v1736_v1 }
  0x9e   :  { %v1320_v3 = vpack.i.bf16 %v138_v58, %v1706_v47  ;;  %v1315_v28 = vpack.i.bf16 %v1746_v4, %v87_v16  ;;  %v1330_v30 = vpack.i.bf16 %v346_v26, %v345_v25 }
  0x9f   :  { %v1340_v13 = vpack.i.bf16 %v86_v7, %v1746_v4  ;;  %v1345_v29 = vpack.i.bf16 %v307_v24, %v306_v22  ;;  %v1233_v7 = vunpack.i.l.bf16 %v1232_v32 }
  0xa0   :  { %1276 = vrot.lane.b32.xlu0 %v1275_v52, %s1561_s5  ;;  %1286 = vrot.lane.b32.xlu1 %v1285_v53, %s1565_s12 }
  0xa1   :  { %1306 = vrot.lane.b32.xlu2 %v1305_v54, %s1563_s10 }
  0xa2   :  { %v1237_v34 = vpop.permute.xlu0 %1236 }
  0xa3   :  { %v1242_v38 = vpop.permute.xlu1 %1241  ;;  %v1239_v50 = vunpack.i.h.bf16 %v1237_v34  ;;  %v1238_v8 = vunpack.i.l.bf16 %v1237_v34 }
  0xa4   :  { %v1244_v51 = vunpack.i.h.bf16 %v1242_v38  ;;  %v1243_v54 = vunpack.i.l.bf16 %v1242_v38 }
  0xa8   :  { %1281 = vrot.lane.b32.xlu0 %v1280_v62, %s1565_s12  ;;  %1301 = vrot.lane.b32.xlu1 %v1300_v63, %s1564_s11  ;;  %v441_v62 = vsel %vm261_vm6, %v1239_v50, %v1243_v54  ;;  %v442_v63 = vsel %vm261_vm6, %v1243_v54, %v1244_v51 }
  0xa9   :  { %1321 = vrot.lane.b32.xlu2 %v1320_v3, %s1561_s5  ;;  %v1234_v3 = vunpack.i.h.bf16 %v1232_v32 }
  0xaa   :  { %v1780_v36 = vpop.permute.xlu0 %1251 }
  0xb0   :  { %1326 = vrot.lane.b32.xlu1 %v1325_v14, %s1562_s9  ;;  %1311 = vrot.lane.b32.xlu0 %v1310_v15, %s1562_s9 }
  0xb1   :  { %1341 = vrot.lane.b32.xlu2 %v1340_v13, %s1560_s0 }
  0xb8   :  { %1331 = vrot.lane.b32.xlu1 %v1330_v30, %s1561_s5  ;;  %1316 = vrot.lane.b32.xlu0 %v1315_v28, %s1560_s0 }
  0xb9   :  { %1346 = vrot.lane.b32.xlu2 %v1345_v29, %s1560_s0 }
  0xc0   :  { %1336 = vrot.lane.b32.xlu1 %v1335_v31, %s1557_s30 }
  0xeb   :  { %v1782_v39 = vpop.permute.xlu2 %1291 }
  0xec   :  { %v1294_v9 = vunpack.i.h.bf16 %v1782_v39  ;;  %v1293_v12 = vunpack.i.l.bf16 %v1782_v39 }
  0xf3   :  { %v1786_v43 = vpop.permute.xlu2 %1296 }
  0xf4   :  { %v1299_v50 = vunpack.i.h.bf16 %v1786_v43  ;;  %v1298_v51 = vunpack.i.l.bf16 %v1786_v43  ;;  %v243_v43 = vsel %vm132_vm3, %v1293_v12, %v1294_v9 }
  0xfb   :  { %v1307_v48 = vpop.permute.xlu2 %1306 }
  0xfc   :  { %v1309_v29 = vunpack.i.h.bf16 %v1307_v48  ;;  %v1308_v30 = vunpack.i.l.bf16 %v1307_v48  ;;  %v263_v48 = vsel %vm261_vm6, %v1234_v3, %v1238_v8 }
 0x101   :  { %v1257_v42 = vpop.permute.xlu1 %1256 }
 0x102   :  { %v1784_v40 = vpop.permute.xlu0 %1261  ;;  %v1259_v56 = vunpack.i.h.bf16 %v1257_v42  ;;  %v1258_v14 = vunpack.i.l.bf16 %v1257_v42 }
 0x103   :  { %v1264_v13 = vunpack.i.h.bf16 %v1784_v40  ;;  %v1801_v22 = vpop.permute.xlu2 %1321  ;;  %v1263_v31 = vunpack.i.l.bf16 %v1784_v40  ;;  %v262_v40 = vsel %vm261_vm6, %v1233_v7, %v1234_v3 }
 0x104   :  { %v1323_v12 = vunpack.i.l.bf16 %v1801_v22 }
 0x10a   :  { %v1788_v45 = vpop.permute.xlu0 %1266  ;;  %v1790_v46 = vpop.permute.xlu1 %1271 }
 0x10b   :  { %v1269_v32 = vunpack.i.h.bf16 %v1788_v45 }
 0x10d   :  { %v402_v54 = vsel %vm163_vm5, %v1269_v32, %v1308_v30 }
 0x112   :  { %v1792_v52 = vpop.permute.xlu0 %1276  ;;  %v1287_v53 = vpop.permute.xlu1 %1286 }
 0x113   :  { %v1289_v57 = vunpack.i.h.bf16 %v1287_v53  ;;  %v1288_v58 = vunpack.i.l.bf16 %v1287_v53  ;;  %v1268_v53 = vunpack.i.l.bf16 %v1788_v45  ;;  %v244_v45 = vsel %vm132_vm3, %v1294_v9, %v1263_v31 }
 0x114   :  { %v1324_v9 = vunpack.i.h.bf16 %v1801_v22  ;;  %v1279_v32 = vunpack.i.h.bf16 %v1792_v52 }
 0x115   :  { %v462_v60 = vsel %vm80_vm4, %v1259_v56, %v1288_v58  ;;  %v463_v61 = vsel %vm80_vm4, %v1288_v58, %v1289_v57  ;;  %v403_v56 = vsel %vm163_vm5, %v1308_v30, %v1309_v29  ;;  %v1274_v57 = vunpack.i.h.bf16 %v1790_v46 }
 0x116   :  { %556 = vmatpush.msra.mxu2 %v462_v60  ;;  %576 = vmatpush.msra.mxu3 %v463_v61  ;;  %v214_v61 = vsel %vm163_vm5, %v1298_v51, %v1299_v50  ;;  %v150_v29 = vsel %vm149_vm1, %v1323_v12, %v1324_v9 }
 0x118   :  { %557 = vmatpush.msra.mxu2 %v441_v62  ;;  %577 = vmatpush.msra.mxu3 %v442_v63  ;;  %v215_v62 = vsel %vm163_vm5, %v1299_v50, %v1268_v53 }
 0x11a   :  { %v1282_v15 = vpop.permute.xlu0 %1281  ;;  %v1302_v16 = vpop.permute.xlu1 %1301 }
 0x11b   :  { %v1284_v24 = vunpack.i.h.bf16 %v1282_v15  ;;  %v1283_v25 = vunpack.i.l.bf16 %v1282_v15  ;;  %v1304_v26 = vunpack.i.h.bf16 %v1302_v16  ;;  %v1303_v28 = vunpack.i.l.bf16 %v1302_v16 }
 0x11c   :  { %v1278_v15 = vunpack.i.l.bf16 %v1792_v52 }
 0x11d   :  { %v291_v34 = vsel %vm80_vm4, %v1283_v25, %v1284_v24  ;;  %v292_v38 = vsel %vm80_vm4, %v1284_v24, %v1258_v14  ;;  %v423_v39 = vsel %vm132_vm3, %v1264_v13, %v1303_v28  ;;  %v424_v42 = vsel %vm132_vm3, %v1303_v28, %v1304_v26  ;;  %v1342_v14 = vpop.permute.xlu2 %1341 }
 0x11e   :  { %516 = vmatpush.msra.mxu0 %v291_v34  ;;  %536 = vmatpush.msra.mxu1 %v292_v38  ;;  %v1273_v13 = vunpack.i.l.bf16 %v1790_v46  ;;  %v1249_v25 = vunpack.i.h.bf16 %v1778_v35  ;;  %v1344_v26 = vunpack.i.h.bf16 %v1342_v14  ;;  %v1343_v28 = vunpack.i.l.bf16 %v1342_v14 }
 0x11f   :  { %558 = vmatpush.msra.mxu2 %v423_v39  ;;  %578 = vmatpush.msra.mxu3 %v424_v42 }
 0x120   :  { %517 = vmatpush.msra.mxu0 %v262_v40  ;;  %537 = vmatpush.msra.mxu1 %v263_v48  ;;  %v97_v42 = vsel %vm60_vm0, %v1343_v28, %v1344_v26  ;;  %v468_v40 = vld [vmem:[%s2051_s1] sm:$0xff]  ;;  %v1254_v48 = vunpack.i.h.bf16 %v1780_v36 }
 0x121   :  { %559 = vmatpush.msra.mxu2 %v402_v54  ;;  %579 = vmatpush.msra.mxu3 %v403_v56 }
 0x122   :  { %518 = vmatpush.msra.mxu0 %v243_v43  ;;  %v1312_v58 = vpop.permute.xlu0 %1311  ;;  %v1327_v60 = vpop.permute.xlu1 %1326  ;;  %538 = vmatpush.msra.mxu1 %v244_v45 }
 0x123   :  { %v1314_v63 = vunpack.i.h.bf16 %v1312_v58  ;;  %v1313_v3 = vunpack.i.l.bf16 %v1312_v58  ;;  %v1329_v7 = vunpack.i.h.bf16 %v1327_v60  ;;  %v1328_v8 = vunpack.i.l.bf16 %v1327_v60  ;;  %560 = vmatpush.msra.mxu2 %v1615_v5  ;;  %580 = vmatpush.msra.mxu3 %v1621_v6 }
 0x124   :  { %519 = vmatpush.msra.mxu0 %v214_v61  ;;  %539 = vmatpush.msra.mxu1 %v215_v62  ;;  %v1248_v5 = vunpack.i.l.bf16 %v1778_v35  ;;  %v1253_v6 = vunpack.i.l.bf16 %v1780_v36  ;;  %v151_v35 = vsel %vm149_vm1, %v1324_v9, %v1278_v15 }
 0x125   :  { %v377_v16 = vsel %vm180_vm2, %v1274_v57, %v1328_v8  ;;  %v378_v24 = vsel %vm180_vm2, %v1328_v8, %v1329_v7  ;;  %v181_v46 = vsel %vm180_vm2, %v1313_v3, %v1314_v63  ;;  %v182_v22 = vsel %vm180_vm2, %v1314_v63, %v1273_v13  ;;  %v1347_v52 = vpop.permute.xlu2 %1346 }
 0x126   :  { %520 = vmatpush.msra.mxu0 %v1633_v10  ;;  %540 = vmatpush.msra.mxu1 %v1635_v11  ;;  %v116_v11 = vsel %vm115_vm7, %v1248_v5, %v1249_v25  ;;  %v117_v31 = vsel %vm115_vm7, %v1249_v25, %v1253_v6  ;;  %v1349_v54 = vunpack.i.h.bf16 %v1347_v52  ;;  %v1348_v43 = vunpack.i.l.bf16 %v1347_v52 }
 0x127   :  { %561 = vmatpush.msra.mxu2 %v377_v16  ;;  %581 = vmatpush.msra.mxu3 %v378_v24 }
 0x128   :  { %521 = vmatpush.msra.mxu0 %v181_v46  ;;  %541 = vmatpush.msra.mxu1 %v182_v22  ;;  %v318_v63 = vsel %vm60_vm0, %v1348_v43, %v1349_v54 }
 0x12a   :  { %522 = vmatpush.msra.mxu0 %v150_v29  ;;  %v1317_v30 = vpop.permute.xlu0 %1316  ;;  %v1332_v10 = vpop.permute.xlu1 %1331  ;;  %542 = vmatpush.msra.mxu1 %v151_v35 }
 0x12b   :  { %v1318_v34 = vunpack.i.l.bf16 %v1317_v30  ;;  %v1334_v38 = vunpack.i.h.bf16 %v1332_v10  ;;  %v1333_v39 = vunpack.i.l.bf16 %v1332_v10  ;;  %v1319_v45 = vunpack.i.h.bf16 %v1317_v30 }
 0x12c   :  { %523 = vmatpush.msra.mxu0 %v116_v11  ;;  %543 = vmatpush.msra.mxu1 %v117_v31 }
 0x12d   :  { %v98_v50 = vsel %vm60_vm0, %v1344_v26, %v1318_v34  ;;  %v356_v51 = vsel %vm149_vm1, %v1279_v32, %v1333_v39  ;;  %v357_v53 = vsel %vm149_vm1, %v1333_v39, %v1334_v38  ;;  %v317_v62 = vsel %vm60_vm0, %v1319_v45, %v1348_v43 }
 0x12e   :  { %524 = vmatpush.msra.mxu0 %v97_v42  ;;  %544 = vmatpush.msra.mxu1 %v98_v50 }
 0x12f   :  { %562 = vmatpush.msra.mxu2 %v356_v51  ;;  %582 = vmatpush.msra.mxu3 %v357_v53 }
 0x130   :  { %1200 = vmatmul.msk.f32.vlgmr.msra.gmra.mxu0 %vm505_vm8, %v468_v40  ;;  %1201 = vmatmul.msk.f32.vlgmr.msra.gmra.mxu1 %vm505_vm8, %v468_v40 }
 0x132   :  { %v1337_v56 = vpop.permute.xlu1 %1336 }
 0x133   :  { %v1339_v57 = vunpack.i.h.bf16 %v1337_v56  ;;  %v1338_v58 = vunpack.i.l.bf16 %v1337_v56 }
 0x135   :  { %v335_v60 = vsel %vm115_vm7, %v1254_v48, %v1338_v58  ;;  %v336_v61 = vsel %vm115_vm7, %v1338_v58, %v1339_v57  ;;  %v1567_v58 = vmov 0  }
 0x136   :  { %563 = vmatpush.msra.mxu2 %v335_v60  ;;  %583 = vmatpush.msra.mxu3 %v336_v61 }
 0x137   :  { %1350 = vset.pattern.permute.xlu0 %v1567_v58  ;;  %1351 = vset.pattern.permute.xlu1 %v1567_v58 }
 0x138   :  { %564 = vmatpush.msra.mxu2 %v317_v62  ;;  %584 = vmatpush.msra.mxu3 %v318_v63 }
 0x139   :  { %1202 = vmatmul.msk.f32.vlgmr.msra.gmra.mxu2 %vm505_vm8, %v468_v40  ;;  %1203 = vmatmul.msk.f32.vlgmr.msra.gmra.mxu3 %vm505_vm8, %v468_v40 }
 0x13a   :  { %1352 = vset.pattern.permute.xlu2 %v1567_v58 }
 0x1ad   :  { %v1857_v36 = vpop.f32.mrf.mxu0  ;;  %v1859_v3 = vpop.f32.mrf.mxu1 }
 0x1ae   :  { %v591_v7 = vadd.f32 %v1859_v3, %v1857_v36  ;;  %v602_v8 = vmul.f32 %v1857_v36, %v1857_v36  ;;  %v603_v9 = vmul.f32 %v1859_v3, %v1859_v3 }
 0x1b0   :  { %592 = vadd.xlane.f32.xlu0 %v591_v7  ;;  %v604_v12 = vadd.f32 %v603_v9, %v602_v8 }
 0x1b2   :  { %605 = vadd.xlane.f32.xlu1 %v604_v12 }
 0x1bc   :  { %v1867_v13 = vpop.f32.mrf.mxu2  ;;  %v1869_v14 = vpop.f32.mrf.mxu3 }
 0x1bd   :  { %v819_v15 = vadd.f32 %v1869_v14, %v1867_v13  ;;  %v830_v16 = vmul.f32 %v1867_v13, %v1867_v13  ;;  %v831_v24 = vmul.f32 %v1869_v14, %v1869_v14 }
 0x1bf   :  { %820 = vadd.xlane.f32.xlu2 %v819_v15  ;;  %v832_v25 = vadd.f32 %v831_v24, %v830_v16 }
 0x1c7   :  { %833 = vadd.xlane.f32.xlu2 %v832_v25 }
 0x223   :  { %v593_v5 = vpop.xlane.xlu0 %592 }
 0x224   :  { %v594_v6 = vrot.slane %v593_v5, 4 }
 0x225   :  { %v606_v46 = vpop.xlane.xlu1 %605 }
 0x226   :  { %v595_v22 = vadd.f32 %v594_v6, %v593_v5  ;;  %v607_v26 = vrot.slane %v606_v46, 4 }
 0x228   :  { %v596_v28 = vrot.slane %v595_v22, 2  ;;  %v608_v29 = vadd.f32 %v607_v26, %v606_v46 }
 0x22a   :  { %v609_v35 = vrot.slane %v608_v29, 2  ;;  %v597_v30 = vadd.f32 %v596_v28, %v595_v22  ;;  %v589_v28 = vld [vmem:[%s2053_s3] sm:$0xff] }
 0x22c   :  { %v598_v10 = vrot.slane %v597_v30, 1  ;;  %v610_v11 = vadd.f32 %v609_v35, %v608_v29 }
 0x22e   :  { %v599_v31 = vadd.f32 %v598_v10, %v597_v30  ;;  %v611_v32 = vrot.slane %v610_v11, 1 }
 0x230   :  { %1208 = vpush %v599_v31  ;;  %v612_v34 = vadd.f32 %v611_v32, %v610_v11  ;;  %v590_v31 = vld [vmem:[%s2054_s4] sm:$0xff] }
 0x232   :  { %1210 = vpush %v612_v34  ;;  %v821_v38 = vpop.xlane.xlu2 %820 }
 0x233   :  { %v822_v39 = vrot.slane %v821_v38, 4 }
 0x235   :  { %v823_v42 = vadd.f32 %v822_v39, %v821_v38 }
 0x237   :  { %v824_v50 = vrot.slane %v823_v42, 2 }
 0x239   :  { %v825_v51 = vadd.f32 %v824_v50, %v823_v42 }
 0x23a   :  { %v834_v53 = vpop.xlane.xlu2 %833 }
 0x23b   :  { %v835_v40 = vrot.slane %v834_v53, 4  ;;  %v826_v52 = vrot.slane %v825_v51, 1 }
 0x23d   :  { %v836_v48 = vadd.f32 %v835_v40, %v834_v53  ;;  %v827_v54 = vadd.f32 %v826_v52, %v825_v51 }
 0x23f   :  { %v837_v56 = vrot.slane %v836_v48, 2  ;;  %1212 = vpush %v827_v54 }
 0x241   :  { %v838_v43 = vadd.f32 %v837_v56, %v836_v48 }
 0x243   :  { %v839_v45 = vrot.slane %v838_v43, 1 }
 0x245   :  { %v840_v57 = vadd.f32 %v839_v45, %v838_v43 }
 0x247   :  { %1214 = vpush %v840_v57 }
 0x261   :  { %s1209_s1 = spop %1208 }
 0x262   :  { %v601_v60 = vstv %s1209_s1 }
 0x263   :  { %v615_v61 = vmul.f32 0.00048828125, %v601_v60  ;;  %s1211_s16 = spop %1210 }
 0x264   :  { %v614_v62 = vstv %s1211_s16 }
 0x265   :  { %v617_v63 = vmul.f32 %v615_v61, %v615_v61  ;;  %v616_v7 = vmul.f32 0.00048828125, %v614_v62  ;;  %v1010_v62 = vld [vmem:[#allocation3 + $0x18] sm:$0xff] }
 0x267   :  { %v618_v8 = vsub.f32 %v616_v7, %v617_v63 }
 0x269   :  { %v619_v9 = vadd.f32 1e-05, %v618_v8  ;;  %v992_v8 = vmul.f32 %v1010_v62, %v1657_v21 }
 0x26b   :  { %1473 = vrsqrt.f32 %v619_v9  ;;  %vm626_vm10 = vweird.f32 %v619_v9 }
 0x270   :  { %s1213_s17 = spop %1212 }
 0x271   :  { %v1474_v12 = vpop.eup %1473  ;;  %v829_v16 = vstv %s1213_s17 }
 0x272   :  { %v621_v15 = vmul.f32 %v1474_v12, %v619_v9  ;;  %v843_v5 = vmul.f32 0.00048828125, %v829_v16  ;;  %vm627_vm9 = vweird.f32 %v1474_v12 }
 0x273   :  { %vm628_vm11 = vmor %vm626_vm10, %vm627_vm9 }
 0x274   :  { %v622_v24 = vmul.f32 %v1474_v12, %v621_v15  ;;  %v845_v22 = vmul.f32 %v843_v5, %v843_v5 }
 0x276   :  { %v623_v25 = vmul.f32 0.5, %v622_v24 }
 0x278   :  { %v624_v6 = vsub.f32 1.5, %v623_v25  ;;  %s1215_s18 = spop %1214 }
 0x279   :  { %v842_v46 = vstv %s1215_s18 }
 0x27a   :  { %v844_v26 = vmul.f32 0.00048828125, %v842_v46  ;;  %v625_v29 = vmul.f32 %v1474_v12, %v624_v6 }
 0x27c   :  { %v846_v35 = vsub.f32 %v844_v26, %v845_v22  ;;  %v629_v30 = vsel %vm628_vm11, %v1474_v12, %v625_v29 }
 0x27d   :  { %v630_v10 = vmul.f32 %v629_v30, %v589_v28 }
 0x27e   :  { %v847_v11 = vadd.f32 1e-05, %v846_v35 }
 0x27f   :  { %635 = vperm.xlu0 %1350, %v630_v10   ;;  %v631_v32 = vmul.f32 %v630_v10, %v615_v61 }
 0x280   :  { %1475 = vrsqrt.f32 %v847_v11  ;;  %vm854_vm13 = vweird.f32 %v847_v11 }
 0x281   :  { %v632_v34 = vsub.f32 %v590_v31, %v631_v32 }
 0x283   :  { %642 = vperm.xlu1 %1351, %v632_v34  }
 0x286   :  { %v1476_v38 = vpop.eup %1475 }
 0x287   :  { %v849_v39 = vmul.f32 %v1476_v38, %v847_v11  ;;  %vm855_vm12 = vweird.f32 %v1476_v38 }
 0x288   :  { %vm856_vm14 = vmor %vm854_vm13, %vm855_vm12 }
 0x289   :  { %v850_v42 = vmul.f32 %v1476_v38, %v849_v39 }
 0x28b   :  { %v851_v50 = vmul.f32 0.5, %v850_v42 }
 0x28d   :  { %v852_v51 = vsub.f32 1.5, %v851_v50 }
 0x28f   :  { %v853_v53 = vmul.f32 %v1476_v38, %v852_v51 }
 0x291   :  { %v857_v40 = vsel %vm856_vm14, %v1476_v38, %v853_v53 }
 0x292   :  { %v858_v52 = vmul.f32 %v857_v40, %v589_v28 }
 0x294   :  { %863 = vperm.xlu2 %1352, %v858_v52   ;;  %v859_v48 = vmul.f32 %v858_v52, %v843_v5 }
 0x296   :  { %v860_v54 = vsub.f32 %v590_v31, %v859_v48 }
 0x298   :  { %870 = vperm.xlu1 %1351, %v860_v54  }
 0x2ee   :  { %v864_v6 = vpop.permute.xlu2 %863 }
 0x2ef   :  { %v866_v28 = vmul.f32 %v864_v6, %v1867_v13  ;;  %v867_v29 = vmul.f32 %v864_v6, %v1869_v14 }
 0x2f1   :  { %v636_v56 = vpop.permute.xlu0 %635 }
 0x2f2   :  { %v638_v43 = vmul.f32 %v636_v56, %v1857_v36  ;;  %v639_v45 = vmul.f32 %v636_v56, %v1859_v3  ;;  %v1031_v3 = vmul.f32 %v1010_v62, %v1655_v20  ;;  %v971_v20 = vmul.f32 %v1010_v62, %v1670_v27 }
 0x2f5   :  { %v643_v57 = vpop.permute.xlu1 %642 }
 0x2f6   :  { %v645_v58 = vadd.f32 %v643_v57, %v638_v43  ;;  %v646_v60 = vadd.f32 %v643_v57, %v639_v45 }
 0x2f8   :  { %v647_v61 = vmul.f32 0.01, %v645_v58  ;;  %v648_v63 = vmul.f32 0.01, %v646_v60 }
 0x2fa   :  { %v1885_v7 = vmax.f32 %v645_v58, %v647_v61  ;;  %v1894_v15 = vmax.f32 %v646_v60, %v648_v63 }
 0x2fc   :  { %v1353_v9 = vpack.i.bf16 %v1885_v7, %v1010_v62  ;;  %v762_v12 = vmul.f32 %v1885_v7, %v1653_v19  ;;  %v801_v36 = vmul.f32 %v1885_v7, %v1651_v18  ;;  %v741_v21 = vmul.f32 %v1885_v7, %v1649_v17 }
 0x2fd   :  { %v763_v25 = vmul.f32 %v1894_v15, %v1664_v23  ;;  %v1358_v5 = vpack.i.bf16 %v1010_v62, %v1894_v15  ;;  %v802_v26 = vmul.f32 %v1894_v15, %v1701_v44  ;;  %v742_v27 = vmul.f32 %v1894_v15, %v1679_v33 }
 0x2fe   :  { %1354 = vrot.lane.b32.xlu0 %v1353_v9, %s1566_s13  ;;  %v1368_v16 = vpack.i.bf16 %v762_v12, %v992_v8  ;;  %v1363_v24 = vpack.i.bf16 %v801_v36, %v1031_v3  ;;  %v1378_v46 = vpack.i.bf16 %v741_v21, %v971_v20  ;;  %v717_v13 = vmul.f32 %v1885_v7, %v1740_v2 }
 0x2ff   :  { %v1383_v22 = vpack.i.bf16 %v992_v8, %v763_v25  ;;  %v1373_v11 = vpack.i.bf16 %v1031_v3, %v802_v26  ;;  %v1388_v34 = vpack.i.bf16 %v971_v20, %v742_v27  ;;  %v718_v14 = vmul.f32 %v1894_v15, %v1687_v37 }
 0x300   :  { %1369 = vrot.lane.b32.xlu2 %v1368_v16, %s1564_s11  ;;  %1364 = vrot.lane.b32.xlu1 %v1363_v24, %s1565_s12  ;;  %v696_v58 = vmul.f32 %v1885_v7, %v1719_v55  ;;  %v657_v8 = vmul.f32 %v1885_v7, %v1736_v1 }
 0x301   :  { %v1393_v50 = vpack.i.bf16 %v718_v14, %v717_v13 }
 0x306   :  { %1359 = vrot.lane.b32.xlu0 %v1358_v5, %s1566_s13 }
 0x308   :  { %1379 = vrot.lane.b32.xlu2 %v1378_v46, %s1563_s10  ;;  %1384 = vrot.lane.b32.xlu1 %v1383_v22, %s1564_s11 }
 0x30a   :  { %v871_v35 = vpop.permute.xlu1 %870 }
 0x30b   :  { %v873_v30 = vadd.f32 %v871_v35, %v866_v28  ;;  %v874_v10 = vadd.f32 %v871_v35, %v867_v29 }
 0x30d   :  { %v875_v31 = vmul.f32 0.01, %v873_v30  ;;  %v876_v32 = vmul.f32 0.01, %v874_v10 }
 0x30e   :  { %1374 = vrot.lane.b32.xlu0 %v1373_v11, %s1565_s12 }
 0x30f   :  { %v1915_v38 = vmax.f32 %v873_v30, %v875_v31  ;;  %v1917_v39 = vmax.f32 %v874_v10, %v876_v32 }
 0x310   :  { %1389 = vrot.lane.b32.xlu1 %v1388_v34, %s1563_s10 }
 0x311   :  { %v1398_v42 = vpack.i.bf16 %v1917_v39, %v1915_v38  ;;  %v1403_v51 = vpack.i.bf16 %v1915_v38, %v1559_v0  ;;  %v946_v53 = vmul.f32 %v1917_v39, %v1687_v37  ;;  %v1408_v40 = vpack.i.bf16 0.0, %v1917_v39 }
 0x312   :  { %v990_v52 = vmul.f32 %v1915_v38, %v1653_v19  ;;  %v991_v48 = vmul.f32 %v1917_v39, %v1664_v23  ;;  %v1029_v0 = vmul.f32 %v1915_v38, %v1651_v18  ;;  %v1030_v56 = vmul.f32 %v1917_v39, %v1701_v44 }
 0x313   :  { %1399 = vrot.lane.b32.xlu2 %v1398_v42, %s1566_s13  ;;  %v1433_v54 = vpack.i.bf16 %v1695_v41, %v946_v53  ;;  %v925_v19 = vmul.f32 %v1917_v39, %v1710_v49  ;;  %v969_v23 = vmul.f32 %v1915_v38, %v1649_v17  ;;  %v970_v45 = vmul.f32 %v1917_v39, %v1679_v33 }
 0x314   :  { %v1418_v37 = vpack.i.bf16 %v991_v48, %v990_v52  ;;  %v1413_v43 = vpack.i.bf16 %v1030_v56, %v1029_v0  ;;  %v945_v44 = vmul.f32 %v1915_v38, %v1740_v2  ;;  %v697_v17 = vmul.f32 %v1894_v15, %v1710_v49 }
 0x315   :  { %v1443_v18 = vpack.i.bf16 %v1706_v47, %v925_v19  ;;  %v1423_v57 = vpack.i.bf16 %v970_v45, %v969_v23  ;;  %v885_v60 = vmul.f32 %v1915_v38, %v1736_v1  ;;  %v924_v2 = vmul.f32 %v1915_v38, %v1719_v55 }
 0x316   :  { %1394 = vrot.lane.b32.xlu0 %v1393_v50, %s1562_s9  ;;  %v1428_v33 = vpack.i.bf16 %v945_v44, %v1695_v41  ;;  %v1458_v61 = vpack.i.bf16 %v697_v17, %v696_v58  ;;  %v886_v41 = vmul.f32 %v1917_v39, %v1730_v59  ;;  %v1463_v49 = vpack.i.bf16 %v1894_v15, %v1885_v7 }
 0x317   :  { %v1448_v62 = vpack.i.bf16 %v885_v60, %v1746_v4  ;;  %v1438_v63 = vpack.i.bf16 %v924_v2, %v1706_v47  ;;  %v658_v47 = vmul.f32 %v1894_v15, %v1730_v59 }
 0x318   :  { %1404 = vrot.lane.b32.xlu1 %v1403_v51, %s1557_s30  ;;  %v1453_v55 = vpack.i.bf16 %v1746_v4, %v886_v41 }
 0x319   :  { %v1468_v9 = vpack.i.bf16 %v658_v47, %v657_v8 }
 0x31b   :  { %1409 = vrot.lane.b32.xlu2 %v1408_v40, %s1557_s30 }
 0x31e   :  { %1434 = vrot.lane.b32.xlu0 %v1433_v54, %s1562_s9 }
 0x320   :  { %1419 = vrot.lane.b32.xlu1 %v1418_v37, %s1564_s11 }
 0x323   :  { %1414 = vrot.lane.b32.xlu2 %v1413_v43, %s1565_s12 }
 0x326   :  { %1444 = vrot.lane.b32.xlu0 %v1443_v18, %s1561_s5 }
 0x328   :  { %1424 = vrot.lane.b32.xlu1 %v1423_v57, %s1563_s10 }
 0x32b   :  { %1429 = vrot.lane.b32.xlu2 %v1428_v33, %s1562_s9 }
 0x32e   :  { %1459 = vrot.lane.b32.xlu0 %v1458_v61, %s1561_s5 }
 0x330   :  { %1449 = vrot.lane.b32.xlu1 %v1448_v62, %s1560_s0 }
 0x333   :  { %1439 = vrot.lane.b32.xlu2 %v1438_v63, %s1561_s5 }
 0x338   :  { %1464 = vrot.lane.b32.xlu1 %v1463_v49, %s1557_s30 }
 0x33b   :  { %1454 = vrot.lane.b32.xlu2 %v1453_v55, %s1560_s0 }
 0x343   :  { %1469 = vrot.lane.b32.xlu2 %v1468_v9, %s1560_s0 }
 0x35a   :  { %v1985_v12 = vpop.permute.xlu2 %1369 }
 0x35b   :  { %v1372_v53 = vunpack.i.h.bf16 %v1985_v12  ;;  %v1371_v61 = vunpack.i.l.bf16 %v1985_v12 }
 0x362   :  { %v1987_v36 = vpop.permute.xlu2 %1379 }
 0x363   :  { %v1382_v0 = vunpack.i.h.bf16 %v1987_v36  ;;  %v1381_v8 = vunpack.i.l.bf16 %v1987_v36 }
 0x36d   :  { %v1400_v3 = vpop.permute.xlu2 %1399 }
 0x36e   :  { %v1402_v5 = vunpack.i.h.bf16 %v1400_v3  ;;  %v1401_v20 = vunpack.i.l.bf16 %v1400_v3 }
 0x370   :  { %v1355_v16 = vpop.permute.xlu0 %1354  ;;  %v1020_v34 = vsel %vm261_vm6, %v1401_v20, %v1402_v5 }
 0x371   :  { %v1356_v6 = vunpack.i.l.bf16 %v1355_v16  ;;  %v1357_v31 = vunpack.i.h.bf16 %v1355_v16 }
 0x372   :  { %v1365_v24 = vpop.permute.xlu1 %1364 }
 0x373   :  { %v1366_v46 = vunpack.i.l.bf16 %v1365_v24  ;;  %v1367_v26 = vunpack.i.h.bf16 %v1365_v24  ;;  %v1021_v13 = vsel %vm261_vm6, %v1402_v5, %v1356_v6 }
 0x375   :  { %v1989_v21 = vpop.permute.xlu2 %1409 }
 0x378   :  { %v1360_v4 = vpop.permute.xlu0 %1359 }
 0x379   :  { %v1362_v27 = vunpack.i.h.bf16 %v1360_v4  ;;  %v1361_v30 = vunpack.i.l.bf16 %v1360_v4 }
 0x37a   :  { %v1385_v25 = vpop.permute.xlu1 %1384 }
 0x37b   :  { %v1387_v14 = vunpack.i.h.bf16 %v1385_v25  ;;  %v1386_v42 = vunpack.i.l.bf16 %v1385_v25  ;;  %v793_v48 = vsel %vm261_vm6, %v1361_v30, %v1362_v27  ;;  %v792_v54 = vsel %vm261_vm6, %v1357_v31, %v1361_v30 }
 0x37c   :  { %v1411_v27 = vunpack.i.l.bf16 %v1989_v21 }
 0x37d   :  { %v1415_v1 = vpop.permute.xlu2 %1414  ;;  %v774_v56 = vsel %vm132_vm3, %v1372_v53, %v1386_v42  ;;  %v775_v37 = vsel %vm132_vm3, %v1386_v42, %v1387_v14  ;;  %v1047_v14 = vld [vmem:[%s2052_s2] sm:$0xff]  ;;  %v1412_v53 = vunpack.i.h.bf16 %v1989_v21  ;;  %s1568_s2 = smov [#allocation11]  }
 0x37e   :  { %v1417_v59 = vunpack.i.h.bf16 %v1415_v1  ;;  %v1416_v22 = vunpack.i.l.bf16 %v1415_v1  ;;  %s1184_s23 = sshll.u32 %s1568_s2, 4  ;;  %s1185_s23 = int_to_ptr.vmem [resolvable:$true] %s1184_s23 }
 0x380   :  { %v1375_v28 = vpop.permute.xlu0 %1374  ;;  %v1041_v29 = vsel %vm80_vm4, %v1416_v22, %v1417_v59  ;;  %v1042_v35 = vsel %vm80_vm4, %v1417_v59, %v1366_v46 }
 0x381   :  { %v1377_v10 = vunpack.i.h.bf16 %v1375_v28  ;;  %v1376_v11 = vunpack.i.l.bf16 %v1375_v28  ;;  %1134 = vmatpush.msrb.mxu2 %v1041_v29  ;;  %1154 = vmatpush.msrb.mxu3 %v1042_v35 }
 0x382   :  { %v1390_v32 = vpop.permute.xlu1 %1389 }
 0x383   :  { %v813_v50 = vsel %vm80_vm4, %v1367_v26, %v1376_v11  ;;  %v814_v51 = vsel %vm80_vm4, %v1376_v11, %v1377_v10  ;;  %1135 = vmatpush.msrb.mxu2 %v1020_v34  ;;  %1155 = vmatpush.msrb.mxu3 %v1021_v13  ;;  %v1392_v40 = vunpack.i.h.bf16 %v1390_v32  ;;  %v1391_v52 = vunpack.i.l.bf16 %v1390_v32 }
 0x384   :  { %1094 = vmatpush.msrb.mxu0 %v813_v50  ;;  %1114 = vmatpush.msrb.mxu1 %v814_v51 }
 0x385   :  { %v753_v45 = vsel %vm163_vm5, %v1382_v0, %v1391_v52  ;;  %v754_v18 = vsel %vm163_vm5, %v1391_v52, %v1392_v40  ;;  %v1430_v44 = vpop.permute.xlu2 %1429 }
 0x386   :  { %1115 = vmatpush.msrb.mxu1 %v793_v48  ;;  %1095 = vmatpush.msrb.mxu0 %v792_v54  ;;  %v1432_v3 = vunpack.i.h.bf16 %v1430_v44  ;;  %v1431_v12 = vunpack.i.l.bf16 %v1430_v44 }
 0x388   :  { %v1395_v19 = vpop.permute.xlu0 %1394  ;;  %1096 = vmatpush.msrb.mxu0 %v774_v56  ;;  %1116 = vmatpush.msrb.mxu1 %v775_v37  ;;  %v956_v36 = vsel %vm180_vm2, %v1431_v12, %v1432_v3 }
 0x389   :  { %v1397_v43 = vunpack.i.h.bf16 %v1395_v19  ;;  %v1396_v23 = vunpack.i.l.bf16 %v1395_v19 }
 0x38a   :  { %v2005_v57 = vpop.permute.xlu1 %1404  ;;  %1097 = vmatpush.msrb.mxu0 %v753_v45  ;;  %1117 = vmatpush.msrb.mxu1 %v754_v18 }
 0x38b   :  { %v729_v58 = vsel %vm180_vm2, %v1396_v23, %v1397_v43  ;;  %v1407_v28 = vunpack.i.h.bf16 %v2005_v57  ;;  %v1406_v29 = vunpack.i.l.bf16 %v2005_v57 }
 0x38c   :  { %1098 = vmatpush.msrb.mxu0 %v1885_v7  ;;  %1118 = vmatpush.msrb.mxu1 %v1894_v15 }
 0x38d   :  { %v1440_v41 = vpop.permute.xlu2 %1439  ;;  %v914_v34 = vsel %vm115_vm7, %v1406_v29, %v1407_v28  ;;  %v915_v13 = vsel %vm115_vm7, %v1407_v28, %v1411_v27 }
 0x38e   :  { %1119 = vmatpush.msrb.mxu1 %v729_v58  ;;  %v1442_v5 = vunpack.i.h.bf16 %v1440_v41  ;;  %v1441_v20 = vunpack.i.l.bf16 %v1440_v41 }
 0x390   :  { %v1435_v17 = vpop.permute.xlu0 %1434  ;;  %v935_v11 = vsel %vm149_vm1, %v1441_v20, %v1442_v5 }
 0x391   :  { %v1437_v33 = vunpack.i.h.bf16 %v1435_v17  ;;  %v1436_v16 = vunpack.i.l.bf16 %v1435_v17 }
 0x392   :  { %v1420_v60 = vpop.permute.xlu1 %1419 }
 0x393   :  { %v1422_v2 = vunpack.i.h.bf16 %v1420_v60  ;;  %v1421_v62 = vunpack.i.l.bf16 %v1420_v60  ;;  %v728_v63 = vsel %vm180_vm2, %v1437_v33, %v1396_v23  ;;  %v957_v26 = vsel %vm180_vm2, %v1432_v3, %v1436_v16 }
 0x394   :  { %1099 = vmatpush.msrb.mxu0 %v728_v63 }
 0x395   :  { %v1002_v49 = vsel %vm132_vm3, %v1421_v62, %v1422_v2  ;;  %v1003_v7 = vsel %vm132_vm3, %v1422_v2, %v1371_v61  ;;  %v1455_v25 = vpop.permute.xlu2 %1454 }
 0x396   :  { %1136 = vmatpush.msrb.mxu2 %v1002_v49  ;;  %1156 = vmatpush.msrb.mxu3 %v1003_v7  ;;  %v1456_v32 = vunpack.i.l.bf16 %v1455_v25  ;;  %v1457_v56 = vunpack.i.h.bf16 %v1455_v25 }
 0x398   :  { %v1445_v15 = vpop.permute.xlu0 %1444 }
 0x399   :  { %v1446_v1 = vunpack.i.l.bf16 %v1445_v15  ;;  %v1447_v46 = vunpack.i.h.bf16 %v1445_v15 }
 0x39a   :  { %v1425_v55 = vpop.permute.xlu1 %1424 }
 0x39b   :  { %v1427_v47 = vunpack.i.h.bf16 %v1425_v55  ;;  %v1426_v9 = vunpack.i.l.bf16 %v1425_v55  ;;  %v936_v31 = vsel %vm149_vm1, %v1442_v5, %v1446_v1 }
 0x39d   :  { %v981_v24 = vsel %vm163_vm5, %v1426_v9, %v1427_v47  ;;  %v982_v4 = vsel %vm163_vm5, %v1427_v47, %v1381_v8  ;;  %v1470_v42 = vpop.permute.xlu2 %1469 }
 0x39e   :  { %1137 = vmatpush.msrb.mxu2 %v981_v24  ;;  %1157 = vmatpush.msrb.mxu3 %v982_v4  ;;  %v1472_v52 = vunpack.i.h.bf16 %v1470_v42  ;;  %v1471_v48 = vunpack.i.l.bf16 %v1470_v42 }
 0x3a0   :  { %v1460_v6 = vpop.permute.xlu0 %1459  ;;  %1138 = vmatpush.msrb.mxu2 %v1915_v38  ;;  %1158 = vmatpush.msrb.mxu3 %v1917_v39  ;;  %v668_v43 = vsel %vm60_vm0, %v1457_v56, %v1471_v48  ;;  %v669_v21 = vsel %vm60_vm0, %v1471_v48, %v1472_v52 }
 0x3a1   :  { %v1462_v59 = vunpack.i.h.bf16 %v1460_v6  ;;  %v1461_v22 = vunpack.i.l.bf16 %v1460_v6 }
 0x3a2   :  { %v1450_v35 = vpop.permute.xlu1 %1449  ;;  %1139 = vmatpush.msrb.mxu2 %v956_v36  ;;  %1159 = vmatpush.msrb.mxu3 %v957_v26 }
 0x3a3   :  { %v707_v38 = vsel %vm149_vm1, %v1447_v46, %v1461_v22  ;;  %v708_v39 = vsel %vm149_vm1, %v1461_v22, %v1462_v59  ;;  %v1452_v30 = vunpack.i.h.bf16 %v1450_v35  ;;  %v1451_v10 = vunpack.i.l.bf16 %v1450_v35 }
 0x3a4   :  { %1100 = vmatpush.msrb.mxu0 %v707_v38  ;;  %1120 = vmatpush.msrb.mxu1 %v708_v39 }
 0x3a5   :  { %1140 = vmatpush.msrb.mxu2 %v935_v11  ;;  %1160 = vmatpush.msrb.mxu3 %v936_v31  ;;  %v896_v50 = vsel %vm60_vm0, %v1451_v10, %v1452_v30  ;;  %v897_v51 = vsel %vm60_vm0, %v1452_v30, %v1456_v32 }
 0x3a7   :  { %1141 = vmatpush.msrb.mxu2 %v914_v34  ;;  %1161 = vmatpush.msrb.mxu3 %v915_v13 }
 0x3a9   :  { %1142 = vmatpush.msrb.mxu2 %v896_v50  ;;  %1162 = vmatpush.msrb.mxu3 %v897_v51 }
 0x3aa   :  { %1206 = vmatmul.msk.f32.vlgmr.msrb.gmra.mxu2 %vm505_vm8, %v1047_v14  ;;  %1207 = vmatmul.msk.f32.vlgmr.msrb.gmra.mxu3 %vm505_vm8, %v1047_v14  ;;  %v1465_v40 = vpop.permute.xlu1 %1464 }
 0x3ab   :  { %v1467_v54 = vunpack.i.h.bf16 %v1465_v40  ;;  %v1466_v0 = vunpack.i.l.bf16 %v1465_v40 }
 0x3ad   :  { %v686_v37 = vsel %vm115_vm7, %v1412_v53, %v1466_v0  ;;  %v687_v19 = vsel %vm115_vm7, %v1466_v0, %v1467_v54 }
 0x3ae   :  { %1101 = vmatpush.msrb.mxu0 %v686_v37  ;;  %1121 = vmatpush.msrb.mxu1 %v687_v19 }
 0x3b0   :  { %1102 = vmatpush.msrb.mxu0 %v668_v43  ;;  %1122 = vmatpush.msrb.mxu1 %v669_v21 }
 0x3b1   :  { %1204 = vmatmul.msk.f32.vlgmr.msrb.gmra.mxu0 %vm505_vm8, %v1047_v14  ;;  %1205 = vmatmul.msk.f32.vlgmr.msrb.gmra.mxu1 %vm505_vm8, %v1047_v14 }
 0x42d   :  { %v1144_v23 = vpop.f32.mrf.mxu2  ;;  %v1164_v45 = vpop.f32.mrf.mxu3 }
 0x42e   :  { %v1169_v18 = vmul.f32 0.01, %v1144_v23  ;;  %v1170_v44 = vmul.f32 0.01, %v1164_v45  ;;  %v1104_v57 = vpop.f32.mrf.mxu0  ;;  %v1124_v58 = vpop.f32.mrf.mxu1 }
 0x42f   :  { %v1167_v17 = vmul.f32 0.01, %v1104_v57  ;;  %v1168_v33 = vmul.f32 0.01, %v1124_v58 }
 0x430   :  { %v1173_v60 = vmax.f32 %v1144_v23, %v1169_v18  ;;  %v1174_v61 = vmax.f32 %v1164_v45, %v1170_v44 }
 0x431   :  { %v1171_v2 = vmax.f32 %v1104_v57, %v1167_v17  ;;  %v1172_v62 = vmax.f32 %v1124_v58, %v1168_v33 }
 0x432   :  { %1178 = vst [vmem:[#allocation11 + $0x10] sm:$0xff] %v1173_v60 }
 0x433   :  { %1179 = vst [vmem:[#allocation11 + $0x18] sm:$0xff] %v1174_v61 }
 0x434   :  { %1175 = vst [vmem:[#allocation11] sm:$0xff] %v1171_v2 }
 0x435   :  { %1176 = vst [vmem:[#allocation11 + $0x8] sm:$0xff] %v1172_v62 }
 0x436   :  { %1192 = dma.vmem_to_hbm [thread:$0]  %s1185_s23, 512, %s1187_s26, [#allocation8], %s1556_s29, %s1556_s29, %s1557_s30  }
 0x437   :  { %1553 = dma.done.wait [#allocation8], 512  }
 0x438   :  { %1554 = vsyncadd [#allocation8], 4294966784 }
 0x439   :  { %1197 = vsyncpa [#allocation7], 1 }
 0x43a   :  { %1198 = vsyncpa [#allocation10], 1 }
 0x43b   :  { %1199 = vsyncpa [#allocation8], 1 }

</bundles_post_ra>
